<compile_context>
chip_gen: v7x
topology: tpu7x:2x2x1
jax: 0.10.0
libtpu: 0.0.40
codegen_flags: <defaults>
</compile_context>

<pallas_src>
import functools
import math

import jax
import jax.numpy as jnp
from jax.experimental import pallas as pl
from jax.experimental.pallas import tpu as pltpu

LANE = 128


def _round_up(x, m):
    return (x + m - 1) // m * m


def _num_tensorcores():
    """Best-effort TensorCore count of the default device (megacore -> 2)."""
    try:
        kind = jax.devices()[0].device_kind.lower()
    except Exception:
        return 1
    for tag in ("v4", "v5p", "v7", "tpu7"):
        if tag in kind:
            return 2
    return 1


# ------------------------------- fused kernel -------------------------------- #

def fused_classifier_kernel(
        # inputs
        x_ref, mask_ref, wt_ref, bt_ref,
        wqkv_ref, bqkv_ref, wo_ref,
        w1_ref, w2_ref, vecs_ref, wh_ref, bh_ref,
        # output
        out_ref,
        # scratch
        act_ref,
        *, num_head, batch_per_block, seq_len, e_real):
    """One grid step == one encoder layer applied to one block of batch rows.

    grid = (batch_blocks ["parallel"], num_layers ["arbitrary"]).
    The activation lives in VMEM scratch across the layer axis; the input linear
    runs at layer==0 and the head+log_softmax at layer==num_layers-1.
    """
    layer = pl.program_id(1)
    num_layers = pl.num_programs(1)

    e_pad = act_ref.shape[-1]
    f_pad = w1_ref.shape[-1]
    head_dim = e_real // num_head
    scale = 1.0 / math.sqrt(head_dim)

    # ---- video_transform (first layer step only) ---------------------------- #
    @pl.when(layer == 0)
    def _():
        act_ref[...] = (
            jnp.dot(x_ref[...], wt_ref[...],
                    preferred_element_type=jnp.float32) + bt_ref[...])

    x = act_ref[...]                                   # (R, e_pad) fp32
    x16 = x.astype(jnp.bfloat16)

    # Per-layer packed small vectors (bo, b1, b2, g1, be1, g2, be2).
    vecs = vecs_ref[0]                                 # (8, VW) fp32
    bo, b1, b2 = vecs[0:1, :e_pad], vecs[1:2, :f_pad], vecs[2:3, :e_pad]
    g1, be1 = vecs[3:4, :e_pad], vecs[4:5, :e_pad]
    g2, be2 = vecs[5:6, :e_pad], vecs[6:7, :e_pad]

    # ---- fused Q/K/V projection on ALL rows (hoisted out of the bb loop) ---- #
    qkv = (jnp.dot(x16, wqkv_ref[0], preferred_element_type=jnp.float32)
           + bqkv_ref[0])                              # (R, 3*e_pad) fp32
    q_all = qkv[:, 0:e_pad]
    k_all = qkv[:, e_pad:2 * e_pad]
    v_all = qkv[:, 2 * e_pad:3 * e_pad]

    # Per-head lane masks: hmask[h, 0, e] = 1 iff h*hd <= e < (h+1)*hd.
    lane = jax.lax.broadcasted_iota(jnp.int32, (num_head, 1, e_pad), 2)
    hidx = jax.lax.broadcasted_iota(jnp.int32, (num_head, 1, e_pad), 0)
    hmask = jnp.logical_and(lane >= hidx * head_dim,
                            lane < (hidx + 1) * head_dim).astype(jnp.float32)

    # ---- per-batch-element scaled-dot-product attention ---------------------- #
    ctx_blocks = []
    for bb in range(batch_per_block):
        r0 = bb * seq_len
        q_b = q_all[r0:r0 + seq_len, :]                 # (S, e_pad)
        k_b = k_all[r0:r0 + seq_len, :]
        v_b = v_all[r0:r0 + seq_len, :]

        # Head-masked queries -> per-head scores via one (H*S, e_pad)x(e_pad, S)
        # contraction (only the 8 real lanes of each head are nonzero).
        qh = (q_b[None] * hmask).astype(jnp.bfloat16)   # (H, S, e_pad)
        qh2 = qh.reshape(num_head * seq_len, e_pad)
        s = jax.lax.dot_general(
            qh2, k_b.astype(jnp.bfloat16),
            (((1,), (1,)), ((), ())),
            preferred_element_type=jnp.float32) * scale  # (H*S, S)
        s = s + mask_ref[bb]                             # additive key-padding mask

        m = jnp.max(s, axis=-1, keepdims=True)
        e = jnp.exp(s - m)
        p = e * pl.reciprocal(jnp.sum(e, axis=-1, keepdims=True), approx=True)
        p = p.reshape(num_head, seq_len, seq_len)        # (H, S, S)

        # Head-masked values: summing the per-head contexts over h yields the
        # concatenated multi-head context directly in the right lane columns.
        vh = (v_b[None] * hmask).astype(jnp.bfloat16)    # (H, S, e_pad)
        ctx_h = jnp.einsum("hqk,hke->hqe", p.astype(jnp.bfloat16), vh,
                           preferred_element_type=jnp.float32)
        ctx_blocks.append(jnp.sum(ctx_h, axis=0))        # (S, e_pad)

    ctx_all = (ctx_blocks[0] if batch_per_block == 1
               else jnp.concatenate(ctx_blocks, axis=0))  # (R, e_pad)

    # Output projection (hoisted: one matmul for the whole row block).
    attn = (jnp.dot(ctx_all.astype(jnp.bfloat16), wo_ref[0],
                    preferred_element_type=jnp.float32) + bo)

    # ---- residual + LayerNorm over the real (unpadded) feature columns ------ #
    col = jax.lax.broadcasted_iota(jnp.int32, (1, e_pad), 1)
    fmask = (col < e_real).astype(jnp.float32)
    inv_e = 1.0 / float(e_real)

    def masked_ln(y, gamma, beta):
        mu = jnp.sum(y * fmask, axis=-1, keepdims=True) * inv_e
        cen = (y - mu) * fmask
        var = jnp.sum(cen * cen, axis=-1, keepdims=True) * inv_e
        return cen * jax.lax.rsqrt(var + 1e-5) * gamma + beta

    x1 = masked_ln(x + attn, g1, be1)

    # ---- feed-forward: Linear -> ReLU -> Linear ------------------------------ #
    h1 = jnp.maximum(
        jnp.dot(x1.astype(jnp.bfloat16), w1_ref[0],
                preferred_element_type=jnp.float32) + b1, 0.0)
    ff = jnp.dot(h1.astype(jnp.bfloat16), w2_ref[0],
                 preferred_element_type=jnp.float32) + b2

    x2 = masked_ln(x1 + ff, g2, be2)
    act_ref[...] = x2

    # ---- classification head + log_softmax (last layer step only) ----------- #
    @pl.when(layer == num_layers - 1)
    def _():
        sc = jnp.dot(x2.astype(jnp.bfloat16), wh_ref[...],
                     preferred_element_type=jnp.float32) + bh_ref[...]
        mx = jnp.max(sc, axis=-1, keepdims=True)
        z = sc - mx
        lse = jnp.log(jnp.sum(jnp.exp(z), axis=-1, keepdims=True))
        out_ref[...] = z - lse


# --------------------------- parameter packing ------------------------------- #

def pack_params(params, num_head):
    """Pad / fuse / stack the unpadded fp32 params for the fused kernel."""
    wt, bt = params["wt"], params["bt"]
    wh, bh = params["wh"], params["bh"]
    layers = params["layers"]
    Din, E = wt.shape
    F = layers[0]["w1"].shape[1]
    C = wh.shape[1]
    L = len(layers)
    Din_p, E_p, F_p, C_p = (_round_up(d, LANE) for d in (Din, E, F, C))
    VW = max(E_p, F_p)

    def pad2(a, shape):
        out = jnp.zeros(shape, jnp.float32)
        return out.at[tuple(slice(0, d) for d in a.shape)].set(a)

    wt_p = pad2(wt, (Din_p, E_p)).astype(jnp.bfloat16)
    bt_p = pad2(bt, (1, E_p))
    wh_p = pad2(wh, (E_p, C_p)).astype(jnp.bfloat16)
    # Padded class columns get a -1e9 bias so log_softmax ignores them.
    bh_p = jnp.full((1, C_p), -1e9, jnp.float32).at[:, :C].set(bh)

    # Fused Q/K/V weight: each projection in its own lane-aligned 128-lane group.
    wqkv_all = jnp.zeros((L, E_p, 3 * E_p), jnp.float32)
    bqkv_all = jnp.zeros((L, 1, 3 * E_p), jnp.float32)
    wo_all = jnp.zeros((L, E_p, E_p), jnp.float32)
    w1_all = jnp.zeros((L, E_p, F_p), jnp.float32)
    w2_all = jnp.zeros((L, F_p, E_p), jnp.float32)
    vecs_all = jnp.zeros((L, 8, VW), jnp.float32)

    for li, p in enumerate(layers):
        wqkv_all = wqkv_all.at[li, :E, 0:E].set(p["wq"])
        wqkv_all = wqkv_all.at[li, :E, E_p:E_p + E].set(p["wk"])
        wqkv_all = wqkv_all.at[li, :E, 2 * E_p:2 * E_p + E].set(p["wv"])
        bqkv_all = bqkv_all.at[li, 0, 0:E].set(p["bq"][0])
        bqkv_all = bqkv_all.at[li, 0, E_p:E_p + E].set(p["bk"][0])
        bqkv_all = bqkv_all.at[li, 0, 2 * E_p:2 * E_p + E].set(p["bv"][0])
        wo_all = wo_all.at[li, :E, :E].set(p["wo"])
        w1_all = w1_all.at[li, :E, :F].set(p["w1"])
        w2_all = w2_all.at[li, :F, :E].set(p["w2"])
        vecs_all = vecs_all.at[li, 0, :E].set(p["bo"][0])
        vecs_all = vecs_all.at[li, 1, :F].set(p["b1"][0])
        vecs_all = vecs_all.at[li, 2, :E].set(p["b2"][0])
        vecs_all = vecs_all.at[li, 3, :E].set(p["g1"][0])
        vecs_all = vecs_all.at[li, 4, :E].set(p["be1"][0])
        vecs_all = vecs_all.at[li, 5, :E].set(p["g2"][0])
        vecs_all = vecs_all.at[li, 6, :E].set(p["be2"][0])

    return dict(
        wt=wt_p, bt=bt_p, wh=wh_p, bh=bh_p,
        wqkv=wqkv_all.astype(jnp.bfloat16), bqkv=bqkv_all,
        wo=wo_all.astype(jnp.bfloat16),
        w1=w1_all.astype(jnp.bfloat16), w2=w2_all.astype(jnp.bfloat16),
        vecs=vecs_all)


# ------------------------------- forward wrapper ------------------------------ #

def classifier_forward(data_batch, params, num_head, *, batch_blocks=None):
    x = data_batch["video_features"].astype(jnp.float32)
    pad_mask = data_batch["video_padding_mask"]
    B, S, Din = x.shape
    E = params["wt"].shape[1]
    F = params["layers"][0]["w1"].shape[1]
    C = params["wh"].shape[1]
    L = len(params["layers"])
    H = num_head
    assert E % H == 0

    if batch_blocks is None:
        # Split the batch across TensorCores only on megacore chips; on single-TC
        # chips (v5e/v6e) use one block so per-layer weights are streamed once.
        n_tc = _num_tensorcores()
        batch_blocks = n_tc if (n_tc > 1 and B % n_tc == 0) else 1
    assert B % batch_blocks == 0
    GB = B // batch_blocks                      # batch elements per grid block
    R = GB * S                                  # rows per block (sublane axis)
    assert R % 8 == 0, "rows per block must be a multiple of 8"

    Din_p = _round_up(Din, LANE)
    E_p = _round_up(E, LANE)
    F_p = _round_up(F, LANE)
    C_p = _round_up(C, LANE)
    VW = max(E_p, F_p)

    packed = pack_params(params, num_head)

    x_pad = jnp.zeros((B * S, Din_p), jnp.bfloat16).at[:, :Din].set(
        x.reshape(B * S, Din).astype(jnp.bfloat16))
    mask_add = jnp.where(pad_mask, -1e9, 0.0).astype(jnp.float32).reshape(B, 1, S)

    kernel = functools.partial(
        fused_classifier_kernel, num_head=H, batch_per_block=GB,
        seq_len=S, e_real=E)

    rows_map = lambda g, l: (g, 0)
    bat_map = lambda g, l: (g, 0, 0)
    lay3 = lambda g, l: (l, 0, 0)
    cst2 = lambda g, l: (0, 0)

    in_specs = [
        pl.BlockSpec((R, Din_p), rows_map),            # video features (this block)
        pl.BlockSpec((GB, 1, S), bat_map),             # additive key-padding mask
        pl.BlockSpec((Din_p, E_p), cst2),              # video_transform weight
        pl.BlockSpec((1, E_p), cst2),                  # video_transform bias
        pl.BlockSpec((1, E_p, 3 * E_p), lay3),         # fused Wqkv (per layer)
        pl.BlockSpec((1, 1, 3 * E_p), lay3),           # fused q/k/v bias
        pl.BlockSpec((1, E_p, E_p), lay3),             # Wo
        pl.BlockSpec((1, E_p, F_p), lay3),             # FFN W1
        pl.BlockSpec((1, F_p, E_p), lay3),             # FFN W2
        pl.BlockSpec((1, 8, VW), lay3),                # stacked bo,b1,b2,g1,be1,g2,be2
        pl.BlockSpec((E_p, C_p), cst2),                # head weight
        pl.BlockSpec((1, C_p), cst2),                  # head bias (-1e9 in padding)
    ]

    out = pl.pallas_call(
        kernel,
        out_shape=jax.ShapeDtypeStruct((B * S, C_p), jnp.float32),
        grid=(batch_blocks, L),
        in_specs=in_specs,
        out_specs=pl.BlockSpec((R, C_p), rows_map),
        scratch_shapes=[pltpu.VMEM((R, E_p), jnp.float32)],   # resident activation
        compiler_params=pltpu.CompilerParams(
            dimension_semantics=("parallel", "arbitrary"),
            vmem_limit_bytes=32 * 1024 * 1024),
    )(x_pad, mask_add, packed["wt"], packed["bt"],
      packed["wqkv"], packed["bqkv"], packed["wo"],
      packed["w1"], packed["w2"], packed["vecs"], packed["wh"], packed["bh"])

    logp = out.reshape(B, S, C_p)[:, :, :C]
    return logp, None, None


# ------------------------------ parameter init -------------------------------- #

def init_params(key, num_input_hidden_video, num_emb, num_hidden,
                max_num_cluster, num_layers):
    def lin(k, i, o, scale=0.05):
        kw, kb = jax.random.split(k)
        return (jax.random.normal(kw, (i, o), jnp.float32) * scale,
                jax.random.normal(kb, (1, o), jnp.float32) * scale)

    keys = jax.random.split(key, 2 + num_layers)
    wt, bt = lin(keys[0], num_input_hidden_video, num_emb)
    wh, bh = lin(keys[1], num_emb, max_num_cluster)
    layers = []
    for l in range(num_layers):
        lk = jax.random.split(keys[2 + l], 6)
        wq, bq = lin(lk[0], num_emb, num_emb)
        wk, bk = lin(lk[1], num_emb, num_emb)
        wv, bv = lin(lk[2], num_emb, num_emb)
        wo, bo = lin(lk[3], num_emb, num_emb)
        w1, b1 = lin(lk[4], num_emb, num_hidden)
        w2, b2 = lin(lk[5], num_hidden, num_emb)
        layers.append(dict(
            wq=wq, bq=bq, wk=wk, bk=bk, wv=wv, bv=bv, wo=wo, bo=bo,
            w1=w1, b1=b1, w2=w2, b2=b2,
            g1=jnp.ones((1, num_emb), jnp.float32),
            be1=jnp.zeros((1, num_emb), jnp.float32),
            g2=jnp.ones((1, num_emb), jnp.float32),
            be2=jnp.zeros((1, num_emb), jnp.float32)))
    return dict(wt=wt, bt=bt, wh=wh, bh=bh, layers=layers)


# ------------------------------ pure-JAX references --------------------------- #

def _ref_ln(y, g, b):
    mu = jnp.mean(y, axis=-1, keepdims=True)
    var = jnp.mean((y - mu) ** 2, axis=-1, keepdims=True)
    return (y - mu) * jax.lax.rsqrt(var + 1e-5) * g + b


def reference_forward(data_batch, params, num_head, matmul_dtype=jnp.float32):
    """Reference forward; matmul_dtype=bfloat16 mirrors the kernel's MXU recipe."""
    def mm(a, b):
        return jnp.dot(a.astype(matmul_dtype), b.astype(matmul_dtype),
                       preferred_element_type=jnp.float32)

    x = data_batch["video_features"].astype(jnp.float32)
    pad = data_batch["video_padding_mask"]
    B, S, _ = x.shape
    H = num_head
    mask_add = jnp.where(pad, -1e9, 0.0).astype(jnp.float32)

    h = mm(x, params["wt"]) + params["bt"][0]
    for p in params["layers"]:
        E = h.shape[-1]
        hd = E // H
        scale = 1.0 / math.sqrt(hd)
        q = mm(h, p["wq"]) + p["bq"][0]
        k = mm(h, p["wk"]) + p["bk"][0]
        v = mm(h, p["wv"]) + p["bv"][0]
        qh, kh, vh = (t.reshape(B, S, H, hd) for t in (q, k, v))
        s = jnp.einsum("bqhd,bkhd->bhqk", qh.astype(matmul_dtype),
                       kh.astype(matmul_dtype),
                       preferred_element_type=jnp.float32) * scale
        s = s + mask_add[:, None, None, :]
        a = jax.nn.softmax(s, axis=-1)
        ctx = jnp.einsum("bhqk,bkhd->bqhd", a.astype(matmul_dtype),
                         vh.astype(matmul_dtype),
                         preferred_element_type=jnp.float32).reshape(B, S, E)
        attn = mm(ctx, p["wo"]) + p["bo"][0]
        x1 = _ref_ln(h + attn, p["g1"][0], p["be1"][0])
        ff = mm(jnp.maximum(mm(x1, p["w1"]) + p["b1"][0], 0.0), p["w2"]) + p["b2"][0]
        h = _ref_ln(x1 + ff, p["g2"][0], p["be2"][0])
    sc = mm(h, params["wh"]) + params["bh"][0]
    return jax.nn.log_softmax(sc, axis=-1)


# ------------------------------------ main ------------------------------------ #

if __name__ == "__main__":
    B, S = 2, 8                     # batch, max_num_video_in_the_batch
    num_input_hidden_video = 64
    num_emb = 32
    num_hidden = 64
    num_head = 4
    num_layers = 2
    max_num_cluster = 8

    key = jax.random.PRNGKey(0)
    k_feat, k_param = jax.random.split(key)

    video_features = jax.random.normal(
        k_feat, (B, S, num_input_hidden_video), jnp.float32)
    # True == padded position (same convention as src_key_padding_mask).
    video_padding_mask = jnp.array(
        [[False] * S,
         [False] * (S - 2) + [True] * 2], dtype=bool)

    data_batch = dict(video_features=video_features,
                      video_padding_mask=video_padding_mask)

    params = init_params(k_param, num_input_hidden_video, num_emb, num_hidden,
                         max_num_cluster, num_layers)

    out, _, _ = classifier_forward(data_batch, params, num_head)
    out = jax.block_until_ready(out)
    assert out.shape == (B, S, max_num_cluster)

    ref_bf16 = jax.block_until_ready(
        reference_forward(data_batch, params, num_head, jnp.bfloat16))
    ref_fp32 = jax.block_until_ready(
        reference_forward(data_batch, params, num_head, jnp.float32))

    err_matched = float(jnp.max(jnp.abs(out - ref_bf16)))
    err_fp32 = float(jnp.max(jnp.abs(out - ref_fp32)))
    assert err_matched < 2e-2, f"bf16-matched max abs err = {err_matched}"
    assert err_fp32 < 1e-1, f"fp32 max abs err = {err_fp32}"

    print("KERNEL_OK")
</pallas_src>

<mosaic_0001>
module attributes {stable_mosaic.version = 11 : i64} {
  func.func @fused_classifier_kernel(%arg0: i32, %arg1: i32, %arg2: memref<16x128xbf16, #tpu.memory_space<vmem>>, %arg3: memref<2x1x8xf32, #tpu.memory_space<vmem>>, %arg4: memref<128x128xbf16, #tpu.memory_space<vmem>>, %arg5: memref<1x128xf32, #tpu.memory_space<vmem>>, %arg6: memref<1x128x384xbf16, #tpu.memory_space<vmem>>, %arg7: memref<1x1x384xf32, #tpu.memory_space<vmem>>, %arg8: memref<1x128x128xbf16, #tpu.memory_space<vmem>>, %arg9: memref<1x128x128xbf16, #tpu.memory_space<vmem>>, %arg10: memref<1x128x128xbf16, #tpu.memory_space<vmem>>, %arg11: memref<1x8x128xf32, #tpu.memory_space<vmem>>, %arg12: memref<128x128xbf16, #tpu.memory_space<vmem>>, %arg13: memref<1x128xf32, #tpu.memory_space<vmem>>, %arg14: memref<16x128xf32, #tpu.memory_space<vmem>>, %arg15: memref<16x128xf32, #tpu.memory_space<vmem>>) attributes {dimension_semantics = [#tpu.dimension_semantics<parallel>, #tpu.dimension_semantics<arbitrary>], iteration_bounds = array<i64: 1, 2>, scalar_prefetch = 0 : i64, scratch_operands = 1 : i64, tpu.core_type = #tpu.core_type<tc>, window_params = [{transform_indices = @transform_0, window_bounds = array<i64: 16, 128>}, {transform_indices = @transform_1, window_bounds = array<i64: 2, 1, 8>}, {pipeline_mode = #tpu.pipeline_mode<synchronous>, transform_indices = @transform_2, window_bounds = array<i64: 128, 128>}, {pipeline_mode = #tpu.pipeline_mode<synchronous>, transform_indices = @transform_3, window_bounds = array<i64: 1, 128>}, {transform_indices = @transform_4, window_bounds = array<i64: 1, 128, 384>}, {transform_indices = @transform_5, window_bounds = array<i64: 1, 1, 384>}, {transform_indices = @transform_6, window_bounds = array<i64: 1, 128, 128>}, {transform_indices = @transform_7, window_bounds = array<i64: 1, 128, 128>}, {transform_indices = @transform_8, window_bounds = array<i64: 1, 128, 128>}, {transform_indices = @transform_9, window_bounds = array<i64: 1, 8, 128>}, {pipeline_mode = #tpu.pipeline_mode<synchronous>, transform_indices = @transform_10, window_bounds = array<i64: 128, 128>}, {pipeline_mode = #tpu.pipeline_mode<synchronous>, transform_indices = @transform_11, window_bounds = array<i64: 1, 128>}, {transform_indices = @transform_12, window_bounds = array<i64: 16, 128>}]} {
    %c0_i32 = arith.constant 0 : i32
    %0 = arith.cmpi eq, %arg1, %c0_i32 : i32
    %1 = arith.extui %0 : i1 to i32
    %c0_i32_0 = arith.constant 0 : i32
    %2 = arith.cmpi ne, %1, %c0_i32_0 : i32
    scf.if %2 {
      %c0_56 = arith.constant 0 : index
      %c0_57 = arith.constant 0 : index
      %189 = vector.load %arg2[%c0_56, %c0_57] : memref<16x128xbf16, #tpu.memory_space<vmem>>, vector<16x128xbf16>
      %c0_58 = arith.constant 0 : index
      %c0_59 = arith.constant 0 : index
      %190 = vector.load %arg4[%c0_58, %c0_59] : memref<128x128xbf16, #tpu.memory_space<vmem>>, vector<128x128xbf16>
      %cst_60 = arith.constant dense<0.000000e+00> : vector<16x128xf32>
      %191 = tpu.matmul %189, %190, %cst_60 {dimension_numbers = #tpu.dot_dimension_numbers<[1], [0], [0], [1], [0, 0, 1, 1], [], []>} : vector<16x128xbf16>, vector<128x128xbf16>, vector<16x128xf32> -> vector<16x128xf32>
      %c0_61 = arith.constant 0 : index
      %c0_62 = arith.constant 0 : index
      %192 = vector.load %arg5[%c0_61, %c0_62] : memref<1x128xf32, #tpu.memory_space<vmem>>, vector<1x128xf32>
      %193 = vector.broadcast %192 : vector<1x128xf32> to vector<16x128xf32>
      %194 = arith.addf %191, %193 : vector<16x128xf32>
      %c0_63 = arith.constant 0 : index
      %c0_64 = arith.constant 0 : index
      %195 = vector.load %arg15[%c0_63, %c0_64] : memref<16x128xf32, #tpu.memory_space<vmem>>, vector<16x128xf32>
      tpu.vector_store %arg15[%c0_63, %c0_64], %194 {strides = array<i32>} : memref<16x128xf32, #tpu.memory_space<vmem>>, vector<16x128xf32>,
    } else {
    }
    %c0 = arith.constant 0 : index
    %c0_1 = arith.constant 0 : index
    %3 = vector.load %arg15[%c0, %c0_1] : memref<16x128xf32, #tpu.memory_space<vmem>>, vector<16x128xf32>
    %4 = arith.truncf %3 : vector<16x128xf32> to vector<16x128xbf16>
    %c0_2 = arith.constant 0 : index
    %c0_3 = arith.constant 0 : index
    %c0_4 = arith.constant 0 : index
    %5 = vector.load %arg11[%c0_2, %c0_3, %c0_4] : memref<1x8x128xf32, #tpu.memory_space<vmem>>, vector<1x8x128xf32>
    %6 = vector.shape_cast %5 : vector<1x8x128xf32> to vector<8x128xf32>
    %7 = vector.extract_strided_slice %6 {offsets = [0, 0], sizes = [1, 128], strides = [1, 1]} : vector<8x128xf32> to vector<1x128xf32>
    %8 = vector.extract_strided_slice %6 {offsets = [1, 0], sizes = [1, 128], strides = [1, 1]} : vector<8x128xf32> to vector<1x128xf32>
    %9 = vector.extract_strided_slice %6 {offsets = [2, 0], sizes = [1, 128], strides = [1, 1]} : vector<8x128xf32> to vector<1x128xf32>
    %10 = vector.extract_strided_slice %6 {offsets = [3, 0], sizes = [1, 128], strides = [1, 1]} : vector<8x128xf32> to vector<1x128xf32>
    %11 = vector.extract_strided_slice %6 {offsets = [4, 0], sizes = [1, 128], strides = [1, 1]} : vector<8x128xf32> to vector<1x128xf32>
    %12 = vector.extract_strided_slice %6 {offsets = [5, 0], sizes = [1, 128], strides = [1, 1]} : vector<8x128xf32> to vector<1x128xf32>
    %13 = vector.extract_strided_slice %6 {offsets = [6, 0], sizes = [1, 128], strides = [1, 1]} : vector<8x128xf32> to vector<1x128xf32>
    %c0_5 = arith.constant 0 : index
    %c0_6 = arith.constant 0 : index
    %c0_7 = arith.constant 0 : index
    %14 = vector.load %arg6[%c0_5, %c0_6, %c0_7] : memref<1x128x384xbf16, #tpu.memory_space<vmem>>, vector<1x128x384xbf16>
    %15 = vector.shape_cast %14 : vector<1x128x384xbf16> to vector<128x384xbf16>
    %cst = arith.constant dense<0.000000e+00> : vector<16x384xf32>
    %16 = tpu.matmul %4, %15, %cst {dimension_numbers = #tpu.dot_dimension_numbers<[1], [0], [0], [1], [0, 0, 1, 1], [], []>} : vector<16x128xbf16>, vector<128x384xbf16>, vector<16x384xf32> -> vector<16x384xf32>
    %c0_8 = arith.constant 0 : index
    %c0_9 = arith.constant 0 : index
    %c0_10 = arith.constant 0 : index
    %17 = vector.load %arg7[%c0_8, %c0_9, %c0_10] : memref<1x1x384xf32, #tpu.memory_space<vmem>>, vector<1x1x384xf32>
    %18 = vector.shape_cast %17 : vector<1x1x384xf32> to vector<1x384xf32>
    %19 = vector.broadcast %18 : vector<1x384xf32> to vector<16x384xf32>
    %20 = arith.addf %16, %19 : vector<16x384xf32>
    %21 = vector.extract_strided_slice %20 {offsets = [0, 0], sizes = [16, 128], strides = [1, 1]} : vector<16x384xf32> to vector<16x128xf32>
    %22 = vector.extract_strided_slice %20 {offsets = [0, 128], sizes = [16, 128], strides = [1, 1]} : vector<16x384xf32> to vector<16x128xf32>
    %23 = vector.extract_strided_slice %20 {offsets = [0, 256], sizes = [16, 128], strides = [1, 1]} : vector<16x384xf32> to vector<16x128xf32>
    %24 = tpu.iota {dimensions = array<i32: 2>} : vector<4x1x128xi32>
    %25 = tpu.iota {dimensions = array<i32: 0>} : vector<4x1x128xi32>
    %c8_i32 = arith.constant 8 : i32
    %26 = vector.broadcast %c8_i32 : i32 to vector<4x1x128xi32>
    %27 = arith.muli %25, %26 : vector<4x1x128xi32>
    %28 = arith.cmpi sge, %24, %27 : vector<4x1x128xi32>
    %c1_i32 = arith.constant 1 : i32
    %29 = vector.broadcast %c1_i32 : i32 to vector<4x1x128xi32>
    %30 = arith.addi %25, %29 : vector<4x1x128xi32>
    %c8_i32_11 = arith.constant 8 : i32
    %31 = vector.broadcast %c8_i32_11 : i32 to vector<4x1x128xi32>
    %32 = arith.muli %30, %31 : vector<4x1x128xi32>
    %33 = arith.cmpi slt, %24, %32 : vector<4x1x128xi32>
    %34 = arith.andi %28, %33 : vector<4x1x128xi1>
    %35 = arith.extui %34 : vector<4x1x128xi1> to vector<4x1x128xi32>
    %36 = arith.sitofp %35 : vector<4x1x128xi32> to vector<4x1x128xf32>
    %37 = vector.extract_strided_slice %21 {offsets = [0, 0], sizes = [8, 128], strides = [1, 1]} : vector<16x128xf32> to vector<8x128xf32>
    %38 = vector.extract_strided_slice %22 {offsets = [0, 0], sizes = [8, 128], strides = [1, 1]} : vector<16x128xf32> to vector<8x128xf32>
    %39 = vector.extract_strided_slice %23 {offsets = [0, 0], sizes = [8, 128], strides = [1, 1]} : vector<16x128xf32> to vector<8x128xf32>
    %40 = vector.shape_cast %37 : vector<8x128xf32> to vector<1x8x128xf32>
    %41 = vector.broadcast %40 : vector<1x8x128xf32> to vector<4x8x128xf32>
    %42 = vector.broadcast %36 : vector<4x1x128xf32> to vector<4x8x128xf32>
    %43 = arith.mulf %41, %42 : vector<4x8x128xf32>
    %44 = arith.truncf %43 : vector<4x8x128xf32> to vector<4x8x128xbf16>
    %45 = vector.shape_cast %44 : vector<4x8x128xbf16> to vector<32x128xbf16>
    %46 = arith.truncf %38 : vector<8x128xf32> to vector<8x128xbf16>
    %cst_12 = arith.constant dense<0.000000e+00> : vector<32x8xf32>
    %47 = tpu.matmul %45, %46, %cst_12 {dimension_numbers = #tpu.dot_dimension_numbers<[1], [1], [0], [0], [0, 0, 1, 0], [], []>} : vector<32x128xbf16>, vector<8x128xbf16>, vector<32x8xf32> -> vector<32x8xf32>
    %cst_13 = arith.constant 0.353553385 : f32
    %48 = vector.broadcast %cst_13 : f32 to vector<32x8xf32>
    %49 = arith.mulf %47, %48 : vector<32x8xf32>
    %c0_14 = arith.constant 0 : index
    %c0_15 = arith.constant 0 : index
    %c0_16 = arith.constant 0 : index
    %50 = vector.load %arg3[%c0_14, %c0_15, %c0_16] : memref<2x1x8xf32, #tpu.memory_space<vmem>>, vector<1x1x8xf32>
    %51 = vector.shape_cast %50 : vector<1x1x8xf32> to vector<1x8xf32>
    %52 = vector.broadcast %51 : vector<1x8xf32> to vector<32x8xf32>
    %53 = arith.addf %49, %52 : vector<32x8xf32>
    %cst_17 = arith.constant dense<0xFF800000> : vector<32xf32>
    %54 = vector.multi_reduction <maximumf>, %53, %cst_17 [1] : vector<32x8xf32> to vector<32xf32>
    %55 = vector.shape_cast %54 : vector<32xf32> to vector<32x1xf32>
    %56 = vector.broadcast %55 : vector<32x1xf32> to vector<32x8xf32>
    %57 = arith.subf %53, %56 : vector<32x8xf32>
    %58 = math.exp %57 : vector<32x8xf32>
    %cst_18 = arith.constant dense<0.000000e+00> : vector<32xf32>
    %59 = vector.multi_reduction <add>, %58, %cst_18 [1] : vector<32x8xf32> to vector<32xf32>
    %60 = vector.shape_cast %59 : vector<32xf32> to vector<32x1xf32>
    %61 = tpu.reciprocal %60 {approx = true} : vector<32x1xf32> -> vector<32x1xf32>
    %62 = vector.broadcast %61 : vector<32x1xf32> to vector<32x8xf32>
    %63 = arith.mulf %58, %62 : vector<32x8xf32>
    %64 = vector.shape_cast %63 : vector<32x8xf32> to vector<4x8x8xf32>
    %65 = vector.shape_cast %39 : vector<8x128xf32> to vector<1x8x128xf32>
    %66 = vector.broadcast %65 : vector<1x8x128xf32> to vector<4x8x128xf32>
    %67 = vector.broadcast %36 : vector<4x1x128xf32> to vector<4x8x128xf32>
    %68 = arith.mulf %66, %67 : vector<4x8x128xf32>
    %69 = arith.truncf %68 : vector<4x8x128xf32> to vector<4x8x128xbf16>
    %70 = arith.truncf %64 : vector<4x8x8xf32> to vector<4x8x8xbf16>
    "tpu.trace_start"() <{level = 10 : i32, message = "hqk,hke->hqe"}> : () -> ()
    %cst_19 = arith.constant dense<0.000000e+00> : vector<4x8x128xf32>
    %71 = tpu.matmul %70, %69, %cst_19 {dimension_numbers = #tpu.dot_dimension_numbers<[2], [1], [1], [2], [0, 0, 0, 1, 1, 2], [0], [0]>} : vector<4x8x8xbf16>, vector<4x8x128xbf16>, vector<4x8x128xf32> -> vector<4x8x128xf32>
    "tpu.trace_stop"() : () -> ()
    %cst_20 = arith.constant dense<0.000000e+00> : vector<8x128xf32>
    %72 = vector.multi_reduction <add>, %71, %cst_20 [0] : vector<4x8x128xf32> to vector<8x128xf32>
    %73 = vector.extract_strided_slice %21 {offsets = [8, 0], sizes = [8, 128], strides = [1, 1]} : vector<16x128xf32> to vector<8x128xf32>
    %74 = vector.extract_strided_slice %22 {offsets = [8, 0], sizes = [8, 128], strides = [1, 1]} : vector<16x128xf32> to vector<8x128xf32>
    %75 = vector.extract_strided_slice %23 {offsets = [8, 0], sizes = [8, 128], strides = [1, 1]} : vector<16x128xf32> to vector<8x128xf32>
    %76 = vector.shape_cast %73 : vector<8x128xf32> to vector<1x8x128xf32>
    %77 = vector.broadcast %76 : vector<1x8x128xf32> to vector<4x8x128xf32>
    %78 = vector.broadcast %36 : vector<4x1x128xf32> to vector<4x8x128xf32>
    %79 = arith.mulf %77, %78 : vector<4x8x128xf32>
    %80 = arith.truncf %79 : vector<4x8x128xf32> to vector<4x8x128xbf16>
    %81 = vector.shape_cast %80 : vector<4x8x128xbf16> to vector<32x128xbf16>
    %82 = arith.truncf %74 : vector<8x128xf32> to vector<8x128xbf16>
    %cst_21 = arith.constant dense<0.000000e+00> : vector<32x8xf32>
    %83 = tpu.matmul %81, %82, %cst_21 {dimension_numbers = #tpu.dot_dimension_numbers<[1], [1], [0], [0], [0, 0, 1, 0], [], []>} : vector<32x128xbf16>, vector<8x128xbf16>, vector<32x8xf32> -> vector<32x8xf32>
    %cst_22 = arith.constant 0.353553385 : f32
    %84 = vector.broadcast %cst_22 : f32 to vector<32x8xf32>
    %85 = arith.mulf %83, %84 : vector<32x8xf32>
    %c1 = arith.constant 1 : index
    %c0_23 = arith.constant 0 : index
    %c0_24 = arith.constant 0 : index
    %86 = vector.load %arg3[%c1, %c0_23, %c0_24] : memref<2x1x8xf32, #tpu.memory_space<vmem>>, vector<1x1x8xf32>
    %87 = vector.shape_cast %86 : vector<1x1x8xf32> to vector<1x8xf32>
    %88 = vector.broadcast %87 : vector<1x8xf32> to vector<32x8xf32>
    %89 = arith.addf %85, %88 : vector<32x8xf32>
    %cst_25 = arith.constant dense<0xFF800000> : vector<32xf32>
    %90 = vector.multi_reduction <maximumf>, %89, %cst_25 [1] : vector<32x8xf32> to vector<32xf32>
    %91 = vector.shape_cast %90 : vector<32xf32> to vector<32x1xf32>
    %92 = vector.broadcast %91 : vector<32x1xf32> to vector<32x8xf32>
    %93 = arith.subf %89, %92 : vector<32x8xf32>
    %94 = math.exp %93 : vector<32x8xf32>
    %cst_26 = arith.constant dense<0.000000e+00> : vector<32xf32>
    %95 = vector.multi_reduction <add>, %94, %cst_26 [1] : vector<32x8xf32> to vector<32xf32>
    %96 = vector.shape_cast %95 : vector<32xf32> to vector<32x1xf32>
    %97 = tpu.reciprocal %96 {approx = true} : vector<32x1xf32> -> vector<32x1xf32>
    %98 = vector.broadcast %97 : vector<32x1xf32> to vector<32x8xf32>
    %99 = arith.mulf %94, %98 : vector<32x8xf32>
    %100 = vector.shape_cast %99 : vector<32x8xf32> to vector<4x8x8xf32>
    %101 = vector.shape_cast %75 : vector<8x128xf32> to vector<1x8x128xf32>
    %102 = vector.broadcast %101 : vector<1x8x128xf32> to vector<4x8x128xf32>
    %103 = vector.broadcast %36 : vector<4x1x128xf32> to vector<4x8x128xf32>
    %104 = arith.mulf %102, %103 : vector<4x8x128xf32>
    %105 = arith.truncf %104 : vector<4x8x128xf32> to vector<4x8x128xbf16>
    %106 = arith.truncf %100 : vector<4x8x8xf32> to vector<4x8x8xbf16>
    "tpu.trace_start"() <{level = 10 : i32, message = "hqk,hke->hqe"}> : () -> ()
    %cst_27 = arith.constant dense<0.000000e+00> : vector<4x8x128xf32>
    %107 = tpu.matmul %106, %105, %cst_27 {dimension_numbers = #tpu.dot_dimension_numbers<[2], [1], [1], [2], [0, 0, 0, 1, 1, 2], [0], [0]>} : vector<4x8x8xbf16>, vector<4x8x128xbf16>, vector<4x8x128xf32> -> vector<4x8x128xf32>
    "tpu.trace_stop"() : () -> ()
    %cst_28 = arith.constant dense<0.000000e+00> : vector<8x128xf32>
    %108 = vector.multi_reduction <add>, %107, %cst_28 [0] : vector<4x8x128xf32> to vector<8x128xf32>
    %109 = tpu.concatenate %72, %108 in 0 : vector<8x128xf32>, vector<8x128xf32> -> vector<16x128xf32>
    %110 = arith.truncf %109 : vector<16x128xf32> to vector<16x128xbf16>
    %c0_29 = arith.constant 0 : index
    %c0_30 = arith.constant 0 : index
    %c0_31 = arith.constant 0 : index
    %111 = vector.load %arg8[%c0_29, %c0_30, %c0_31] : memref<1x128x128xbf16, #tpu.memory_space<vmem>>, vector<1x128x128xbf16>
    %112 = vector.shape_cast %111 : vector<1x128x128xbf16> to vector<128x128xbf16>
    %cst_32 = arith.constant dense<0.000000e+00> : vector<16x128xf32>
    %113 = tpu.matmul %110, %112, %cst_32 {dimension_numbers = #tpu.dot_dimension_numbers<[1], [0], [0], [1], [0, 0, 1, 1], [], []>} : vector<16x128xbf16>, vector<128x128xbf16>, vector<16x128xf32> -> vector<16x128xf32>
    %114 = vector.broadcast %7 : vector<1x128xf32> to vector<16x128xf32>
    %115 = arith.addf %113, %114 : vector<16x128xf32>
    %116 = tpu.iota {dimensions = array<i32: 1>} : vector<1x128xi32>
    %c32_i32 = arith.constant 32 : i32
    %117 = vector.broadcast %c32_i32 : i32 to vector<1x128xi32>
    %118 = arith.cmpi slt, %116, %117 : vector<1x128xi32>
    %119 = arith.extui %118 : vector<1x128xi1> to vector<1x128xi32>
    %120 = arith.sitofp %119 : vector<1x128xi32> to vector<1x128xf32>
    %121 = arith.addf %3, %115 : vector<16x128xf32>
    %122 = vector.broadcast %120 : vector<1x128xf32> to vector<16x128xf32>
    %123 = arith.mulf %121, %122 : vector<16x128xf32>
    %cst_33 = arith.constant dense<0.000000e+00> : vector<16xf32>
    %124 = vector.multi_reduction <add>, %123, %cst_33 [1] : vector<16x128xf32> to vector<16xf32>
    %125 = vector.shape_cast %124 : vector<16xf32> to vector<16x1xf32>
    %cst_34 = arith.constant 3.125000e-02 : f32
    %126 = vector.broadcast %cst_34 : f32 to vector<16x1xf32>
    %127 = arith.mulf %125, %126 : vector<16x1xf32>
    %128 = vector.broadcast %127 : vector<16x1xf32> to vector<16x128xf32>
    %129 = arith.subf %121, %128 : vector<16x128xf32>
    %130 = vector.broadcast %120 : vector<1x128xf32> to vector<16x128xf32>
    %131 = arith.mulf %129, %130 : vector<16x128xf32>
    %132 = arith.mulf %131, %131 : vector<16x128xf32>
    %cst_35 = arith.constant dense<0.000000e+00> : vector<16xf32>
    %133 = vector.multi_reduction <add>, %132, %cst_35 [1] : vector<16x128xf32> to vector<16xf32>
    %134 = vector.shape_cast %133 : vector<16xf32> to vector<16x1xf32>
    %cst_36 = arith.constant 3.125000e-02 : f32
    %135 = vector.broadcast %cst_36 : f32 to vector<16x1xf32>
    %136 = arith.mulf %134, %135 : vector<16x1xf32>
    %cst_37 = arith.constant 9.99999974E-6 : f32
    %137 = vector.broadcast %cst_37 : f32 to vector<16x1xf32>
    %138 = arith.addf %136, %137 : vector<16x1xf32>
    %139 = math.rsqrt %138 : vector<16x1xf32>
    %140 = vector.broadcast %139 : vector<16x1xf32> to vector<16x128xf32>
    %141 = arith.mulf %131, %140 : vector<16x128xf32>
    %142 = vector.broadcast %10 : vector<1x128xf32> to vector<16x128xf32>
    %143 = arith.mulf %141, %142 : vector<16x128xf32>
    %144 = vector.broadcast %11 : vector<1x128xf32> to vector<16x128xf32>
    %145 = arith.addf %143, %144 : vector<16x128xf32>
    %146 = arith.truncf %145 : vector<16x128xf32> to vector<16x128xbf16>
    %c0_38 = arith.constant 0 : index
    %c0_39 = arith.constant 0 : index
    %c0_40 = arith.constant 0 : index
    %147 = vector.load %arg9[%c0_38, %c0_39, %c0_40] : memref<1x128x128xbf16, #tpu.memory_space<vmem>>, vector<1x128x128xbf16>
    %148 = vector.shape_cast %147 : vector<1x128x128xbf16> to vector<128x128xbf16>
    %cst_41 = arith.constant dense<0.000000e+00> : vector<16x128xf32>
    %149 = tpu.matmul %146, %148, %cst_41 {dimension_numbers = #tpu.dot_dimension_numbers<[1], [0], [0], [1], [0, 0, 1, 1], [], []>} : vector<16x128xbf16>, vector<128x128xbf16>, vector<16x128xf32> -> vector<16x128xf32>
    %150 = vector.broadcast %8 : vector<1x128xf32> to vector<16x128xf32>
    %151 = arith.addf %149, %150 : vector<16x128xf32>
    %cst_42 = arith.constant 0.000000e+00 : f32
    %152 = vector.broadcast %cst_42 : f32 to vector<16x128xf32>
    %153 = arith.maximumf %151, %152 : vector<16x128xf32>
    %154 = arith.truncf %153 : vector<16x128xf32> to vector<16x128xbf16>
    %c0_43 = arith.constant 0 : index
    %c0_44 = arith.constant 0 : index
    %c0_45 = arith.constant 0 : index
    %155 = vector.load %arg10[%c0_43, %c0_44, %c0_45] : memref<1x128x128xbf16, #tpu.memory_space<vmem>>, vector<1x128x128xbf16>
    %156 = vector.shape_cast %155 : vector<1x128x128xbf16> to vector<128x128xbf16>
    %cst_46 = arith.constant dense<0.000000e+00> : vector<16x128xf32>
    %157 = tpu.matmul %154, %156, %cst_46 {dimension_numbers = #tpu.dot_dimension_numbers<[1], [0], [0], [1], [0, 0, 1, 1], [], []>} : vector<16x128xbf16>, vector<128x128xbf16>, vector<16x128xf32> -> vector<16x128xf32>
    %158 = vector.broadcast %9 : vector<1x128xf32> to vector<16x128xf32>
    %159 = arith.addf %157, %158 : vector<16x128xf32>
    %160 = arith.addf %145, %159 : vector<16x128xf32>
    %161 = vector.broadcast %120 : vector<1x128xf32> to vector<16x128xf32>
    %162 = arith.mulf %160, %161 : vector<16x128xf32>
    %cst_47 = arith.constant dense<0.000000e+00> : vector<16xf32>
    %163 = vector.multi_reduction <add>, %162, %cst_47 [1] : vector<16x128xf32> to vector<16xf32>
    %164 = vector.shape_cast %163 : vector<16xf32> to vector<16x1xf32>
    %cst_48 = arith.constant 3.125000e-02 : f32
    %165 = vector.broadcast %cst_48 : f32 to vector<16x1xf32>
    %166 = arith.mulf %164, %165 : vector<16x1xf32>
    %167 = vector.broadcast %166 : vector<16x1xf32> to vector<16x128xf32>
    %168 = arith.subf %160, %167 : vector<16x128xf32>
    %169 = vector.broadcast %120 : vector<1x128xf32> to vector<16x128xf32>
    %170 = arith.mulf %168, %169 : vector<16x128xf32>
    %171 = arith.mulf %170, %170 : vector<16x128xf32>
    %cst_49 = arith.constant dense<0.000000e+00> : vector<16xf32>
    %172 = vector.multi_reduction <add>, %171, %cst_49 [1] : vector<16x128xf32> to vector<16xf32>
    %173 = vector.shape_cast %172 : vector<16xf32> to vector<16x1xf32>
    %cst_50 = arith.constant 3.125000e-02 : f32
    %174 = vector.broadcast %cst_50 : f32 to vector<16x1xf32>
    %175 = arith.mulf %173, %174 : vector<16x1xf32>
    %cst_51 = arith.constant 9.99999974E-6 : f32
    %176 = vector.broadcast %cst_51 : f32 to vector<16x1xf32>
    %177 = arith.addf %175, %176 : vector<16x1xf32>
    %178 = math.rsqrt %177 : vector<16x1xf32>
    %179 = vector.broadcast %178 : vector<16x1xf32> to vector<16x128xf32>
    %180 = arith.mulf %170, %179 : vector<16x128xf32>
    %181 = vector.broadcast %12 : vector<1x128xf32> to vector<16x128xf32>
    %182 = arith.mulf %180, %181 : vector<16x128xf32>
    %183 = vector.broadcast %13 : vector<1x128xf32> to vector<16x128xf32>
    %184 = arith.addf %182, %183 : vector<16x128xf32>
    %c0_52 = arith.constant 0 : index
    %c0_53 = arith.constant 0 : index
    %185 = vector.load %arg15[%c0_52, %c0_53] : memref<16x128xf32, #tpu.memory_space<vmem>>, vector<16x128xf32>
    tpu.vector_store %arg15[%c0_52, %c0_53], %184 {strides = array<i32>} : memref<16x128xf32, #tpu.memory_space<vmem>>, vector<16x128xf32>,
    %c1_i32_54 = arith.constant 1 : i32
    %186 = arith.cmpi eq, %arg1, %c1_i32_54 : i32
    %187 = arith.extui %186 : i1 to i32
    %c0_i32_55 = arith.constant 0 : i32
    %188 = arith.cmpi ne, %187, %c0_i32_55 : i32
    scf.if %188 {
      %189 = arith.truncf %184 : vector<16x128xf32> to vector<16x128xbf16>
      %c0_56 = arith.constant 0 : index
      %c0_57 = arith.constant 0 : index
      %190 = vector.load %arg12[%c0_56, %c0_57] : memref<128x128xbf16, #tpu.memory_space<vmem>>, vector<128x128xbf16>
      %cst_58 = arith.constant dense<0.000000e+00> : vector<16x128xf32>
      %191 = tpu.matmul %189, %190, %cst_58 {dimension_numbers = #tpu.dot_dimension_numbers<[1], [0], [0], [1], [0, 0, 1, 1], [], []>} : vector<16x128xbf16>, vector<128x128xbf16>, vector<16x128xf32> -> vector<16x128xf32>
      %c0_59 = arith.constant 0 : index
      %c0_60 = arith.constant 0 : index
      %192 = vector.load %arg13[%c0_59, %c0_60] : memref<1x128xf32, #tpu.memory_space<vmem>>, vector<1x128xf32>
      %193 = vector.broadcast %192 : vector<1x128xf32> to vector<16x128xf32>
      %194 = arith.addf %191, %193 : vector<16x128xf32>
      %cst_61 = arith.constant dense<0xFF800000> : vector<16xf32>
      %195 = vector.multi_reduction <maximumf>, %194, %cst_61 [1] : vector<16x128xf32> to vector<16xf32>
      %196 = vector.shape_cast %195 : vector<16xf32> to vector<16x1xf32>
      %197 = vector.broadcast %196 : vector<16x1xf32> to vector<16x128xf32>
      %198 = arith.subf %194, %197 : vector<16x128xf32>
      %199 = math.exp %198 : vector<16x128xf32>
      %cst_62 = arith.constant dense<0.000000e+00> : vector<16xf32>
      %200 = vector.multi_reduction <add>, %199, %cst_62 [1] : vector<16x128xf32> to vector<16xf32>
      %201 = vector.shape_cast %200 : vector<16xf32> to vector<16x1xf32>
      %202 = math.log %201 : vector<16x1xf32>
      %203 = vector.broadcast %202 : vector<16x1xf32> to vector<16x128xf32>
      %204 = arith.subf %198, %203 : vector<16x128xf32>
      %c0_63 = arith.constant 0 : index
      %c0_64 = arith.constant 0 : index
      %205 = vector.load %arg14[%c0_63, %c0_64] : memref<16x128xf32, #tpu.memory_space<vmem>>, vector<16x128xf32>
      tpu.vector_store %arg14[%c0_63, %c0_64], %204 {strides = array<i32>} : memref<16x128xf32, #tpu.memory_space<vmem>>, vector<16x128xf32>,
    } else {
    }
    return
  }
  func.func @transform_0(%arg0: i32, %arg1: i32) -> (i32, i32) {
    %c0_i32 = arith.constant 0 : i32
    %c0_i32_0 = arith.constant 0 : i32
    return %arg0, %c0_i32 : i32, i32
  }
  func.func @transform_1(%arg0: i32, %arg1: i32) -> (i32, i32, i32) {
    %c0_i32 = arith.constant 0 : i32
    %c0_i32_0 = arith.constant 0 : i32
    %c0_i32_1 = arith.constant 0 : i32
    return %arg0, %c0_i32, %c0_i32_0 : i32, i32, i32
  }
  func.func @transform_2(%arg0: i32, %arg1: i32) -> (i32, i32) {
    %c0_i32 = arith.constant 0 : i32
    %c0_i32_0 = arith.constant 0 : i32
    %c0_i32_1 = arith.constant 0 : i32
    return %c0_i32, %c0_i32_0 : i32, i32
  }
  func.func @transform_3(%arg0: i32, %arg1: i32) -> (i32, i32) {
    %c0_i32 = arith.constant 0 : i32
    %c0_i32_0 = arith.constant 0 : i32
    %c0_i32_1 = arith.constant 0 : i32
    return %c0_i32, %c0_i32_0 : i32, i32
  }
  func.func @transform_4(%arg0: i32, %arg1: i32) -> (i32, i32, i32) {
    %c0_i32 = arith.constant 0 : i32
    %c0_i32_0 = arith.constant 0 : i32
    %c0_i32_1 = arith.constant 0 : i32
    return %arg1, %c0_i32, %c0_i32_0 : i32, i32, i32
  }
  func.func @transform_5(%arg0: i32, %arg1: i32) -> (i32, i32, i32) {
    %c0_i32 = arith.constant 0 : i32
    %c0_i32_0 = arith.constant 0 : i32
    %c0_i32_1 = arith.constant 0 : i32
    return %arg1, %c0_i32, %c0_i32_0 : i32, i32, i32
  }
  func.func @transform_6(%arg0: i32, %arg1: i32) -> (i32, i32, i32) {
    %c0_i32 = arith.constant 0 : i32
    %c0_i32_0 = arith.constant 0 : i32
    %c0_i32_1 = arith.constant 0 : i32
    return %arg1, %c0_i32, %c0_i32_0 : i32, i32, i32
  }
  func.func @transform_7(%arg0: i32, %arg1: i32) -> (i32, i32, i32) {
    %c0_i32 = arith.constant 0 : i32
    %c0_i32_0 = arith.constant 0 : i32
    %c0_i32_1 = arith.constant 0 : i32
    return %arg1, %c0_i32, %c0_i32_0 : i32, i32, i32
  }
  func.func @transform_8(%arg0: i32, %arg1: i32) -> (i32, i32, i32) {
    %c0_i32 = arith.constant 0 : i32
    %c0_i32_0 = arith.constant 0 : i32
    %c0_i32_1 = arith.constant 0 : i32
    return %arg1, %c0_i32, %c0_i32_0 : i32, i32, i32
  }
  func.func @transform_9(%arg0: i32, %arg1: i32) -> (i32, i32, i32) {
    %c0_i32 = arith.constant 0 : i32
    %c0_i32_0 = arith.constant 0 : i32
    %c0_i32_1 = arith.constant 0 : i32
    return %arg1, %c0_i32, %c0_i32_0 : i32, i32, i32
  }
  func.func @transform_10(%arg0: i32, %arg1: i32) -> (i32, i32) {
    %c0_i32 = arith.constant 0 : i32
    %c0_i32_0 = arith.constant 0 : i32
    %c0_i32_1 = arith.constant 0 : i32
    return %c0_i32, %c0_i32_0 : i32, i32
  }
  func.func @transform_11(%arg0: i32, %arg1: i32) -> (i32, i32) {
    %c0_i32 = arith.constant 0 : i32
    %c0_i32_0 = arith.constant 0 : i32
    %c0_i32_1 = arith.constant 0 : i32
    return %c0_i32, %c0_i32_0 : i32, i32
  }
  func.func @transform_12(%arg0: i32, %arg1: i32) -> (i32, i32) {
    %c0_i32 = arith.constant 0 : i32
    %c0_i32_0 = arith.constant 0 : i32
    return %arg0, %c0_i32 : i32, i32
  }
}

</mosaic_0001>

<bundles_post_ra>
// kernel: tpu_custom_call.1
= control target key start
LH: loop header
LB: loop body
LE: loop exit
PB: predicated region body
PF: predicated region fallthrough
CT: control target
= control target key end

     0   :  { %s4182_s0 = inlined_call_operand.hbm [shape: bf16[16,128], index: 0, kind: input, shape index: {}]   ;;  %s4183_s1 = inlined_call_operand.vmem [shape: f32[2,1,8], index: 1, kind: input, shape index: {}]   ;;  %s4184_s2 = inlined_call_operand.hbm [shape: bf16[128,128], index: 2, kind: input, shape index: {}]   ;;  %s4185_s3 = inlined_call_operand.vmem [shape: f32[1,128], index: 3, kind: input, shape index: {}]   ;;  %s4186_s4 = inlined_call_operand.hbm [shape: bf16[2,128,384], index: 4, kind: input, shape index: {}]   ;;  %s4187_s5 = inlined_call_operand.vmem [shape: f32[2,1,384], index: 5, kind: input, shape index: {}]   ;;  %s4188_s6 = inlined_call_operand.hbm [shape: bf16[2,128,128], index: 6, kind: input, shape index: {}]   ;;  %s4189_s7 = inlined_call_operand.hbm [shape: bf16[2,128,128], index: 7, kind: input, shape index: {}]   ;;  %s4190_s8 = inlined_call_operand.hbm [shape: bf16[2,128,128], index: 8, kind: input, shape index: {}]   ;;  %s4191_s9 = inlined_call_operand.vmem [shape: f32[2,8,128], index: 9, kind: input, shape index: {}]   ;;  %s4192_s10 = inlined_call_operand.hbm [shape: bf16[128,128], index: 10, kind: input, shape index: {}]   ;;  %s4193_s11 = inlined_call_operand.vmem [shape: f32[1,128], index: 11, kind: input, shape index: {}]   ;;  %s4194_s12 = inlined_call_operand.hbm [shape: f32[16,128], index: 12, kind: output, shape index: {}]  }
   0x1   :  { %4213 = sst [smem:[#allocation23_spill]] %s4182_s0 }
   0x2   :  { %4214 = sst [smem:[#allocation24_spill]] %s4183_s1 }
   0x3   :  { %4215 = sst [smem:[#allocation25_spill]] %s4185_s3 }
   0x4   :  { %4216 = sst [smem:[#allocation26_spill]] %s4186_s4 }
   0x5   :  { %4217 = sst [smem:[#allocation27_spill]] %s4187_s5 }
   0x6   :  { %4218 = sst [smem:[#allocation28_spill]] %s4188_s6 }
   0x7   :  { %4219 = sst [smem:[#allocation29_spill]] %s4191_s9 }
   0x8   :  { %4220 = sst [smem:[#allocation30_spill]] %s4193_s11 }
   0x9   :  { %4221 = sst [smem:[#allocation31_spill]] %s4194_s12 }
   0xa   :  { %17 = vsyncpa [#allocation4], 0 }
   0xb   :  { %18 = vsyncpa [#allocation7], 0 }
   0xc   :  { %19 = vsyncpa [#allocation5], 0  ;;  %s3511_s21 = smov 0   ;;  %s3513_s22 = smov 0  }
   0xd   :  { %s3515_s23 = smov 0   ;;  %s3517_s24 = smov 0  }
   0xe   :  { %s3519_s25 = smov 0   ;;  %s3521_s26 = smov 0  }
   0xf LB: > { %4222 = sst [smem:[#allocation19_spill]] %s3415_s24  ;;  %s3540_s27 = sadd.s32 4294967295, %s3423_s26   ;;  %s3423_s26 = sphi %s3521_s26, %s25_s26   ;;  %s3419_s25 = sphi %s3519_s25, %s4263_s25   ;;  %s3415_s24 = sphi %s3517_s24, %s4262_s24   ;;  %s3411_s23 = sphi %s3515_s23, %s4266_s23   ;;  %s3407_s22 = sphi %s3513_s22, %s4265_s22   ;;  %s3403_s21 = sphi %s3511_s21, %s4264_s21  }
  0x10   : > { %4223 = sst [smem:[#allocation20_spill]] %s3419_s25  ;;  %p145_p0 = scmp.ne.s32.totalorder %s3411_s23, %s3407_s22 }
  0x11   : > { %p146_p1 = scmp.eq.s32.totalorder %s3423_s26, 0  ;;  %p151_p2 = scmp.ne.s32.totalorder %s3407_s22, %s3403_s21 }
  0x12   : > { %p4196_p3 = scmp.eq.s32.totalorder %s3540_s27, 0  ;;  %p2480_p5 = scmp.ge.s32.totalorder %s3423_s26, 1 }
  0x13   : > { %p147_p4 = por %p146_p1, %p145_p0  ;;  %p360_p7 = scmp.lt.s32.totalorder %s3423_s26, 3 }
  0x14   : > { %p3551_p6 = por %p4196_p3, %p151_p2  ;;  %s3425_s13 = smov [#allocation3]  }
  0x15   : > { %p3556_p8 = pnand %p2480_p5, %p360_p7  ;;  %s375_s14 = sshll.u32 %s3425_s13, 4  ;;  %s376_s14 = int_to_ptr.vmem [resolvable:$true] %s375_s14 }
  0x16   : > { %s4224_s29 = scalar_select %p3551_p6, 1, 0 }
  0x17   : > { %s4225_s30 = scalar_select %p3556_p8, 1, 0 }
  0x18   : > { %p2909_p9 = pneg %p3556_p8  ;;  %p2935_p10 = scmp.lt.s32.totalorder %s3423_s26, 2 }
  0x19   : > { %s34_s17 = sadd.s32 1, %s3419_s25  ;;  %s4228_s0 = sld [smem:[#allocation23_spill]] }
  0x1a   : > { %p3565_p11 = pnand %p2909_p9, %p4196_p3  ;;  %p3569_p12 = pnand %p2935_p10, %p147_p4 }
  0x1c   : > { %s4226_s15 = scalar_select %p3565_p11, 1, 0 }
  0x1d   : > { %s4227_s16 = scalar_select %p3569_p12, 1, 0 }
  0x1e   : > { %p3582_p0 = pneg %p3565_p11 }
  0x1f   : > { %s3127_s20 = scalar_lea.hbm %s4228_s0, 128 }
  0x20   : > { %p3128_p13 = scmp.ne.s32.totalorder %s4228_s0, %s3127_s20  ;;  %p3134_p4 = scmp.lt.u32.totalorder %s3127_s20, %s4228_s0 }
  0x21   : > { %s4229_s28 = scalar_select %p3582_p0, 1, 0 }
  0x22   : > { %p3130_p1 = pnand %p3582_p0, %p3128_p13 }
  0x24   : > { %p3131_p2 = pneg %p3130_p1 }
  0x26   : > { %p3136_p5 = pnand %p3134_p4, %p3131_p2 }
  0x28   : > { %3139 = shalt.err (!%p3136_p5)
}
  0x29   : > { %s3140_s18 = scalar_lea.vmem %s376_s14, 128  ;;  %p3148_p3 = scmp.lt.s32.totalorder %s376_s14, %s376_s14 }
  0x2a   : > { %p3141_p7 = scmp.ne.s32.totalorder %s376_s14, %s3140_s18  ;;  %p3149_p6 = scmp.lt.s32.totalorder %s3140_s18, %s3140_s18 }
  0x2c   : > { %p3143_p9 = pnand %p3141_p7, %p3582_p0  ;;  %p3150_p8 = por %p3149_p6, %p3148_p3 }
  0x2e   : > { %p3144_p10 = pneg %p3143_p9 }
  0x30   : > { %p3151_p12 = pnand %p3150_p8, %p3144_p10 }
  0x32   : > { %3154 = shalt.err (!%p3151_p12)
}
  0x33   : > { %s4202_s19 = smov 64   ;;  %s4204_s11 = smov 4  }
  0x34   : > { %2912 = dma.hbm_to_vmem [thread:$0]  (!%p3565_p11), %s4228_s0, 128, %s376_s14, [#allocation4], %s4202_s19, %s4202_s19, %s4204_s11  }
  0x35   : > { %p35_p3 = scmp.ge.s32.totalorder %s34_s17, 2  ;;  %s429_s21 = sand.u32 1, %s3423_s26  }
  0x36   : > { %s431_s13 = sand.u32 1, %s3411_s23   ;;  %s2882_s3 = smul.u32 3072, %s3419_s25 }
  0x37   : > { %s4268_s17 = smov (%p35_p3, %s34_s17), 0  ;;  %s2881_s18 = smul.u32 192, %s431_s13 }
  0x38   : > { %4230 = sst [smem:[#allocation21_spill]] %s4268_s17  ;;  %s135_s1 = ssub.s32 %s3419_s25, %s4268_s17 }
  0x39   : > { %p136_p6 = scmp.eq.s32.totalorder %s135_s1, 0  ;;  %s4231_s4 = sld [smem:[#allocation26_spill]] }
  0x3a   : > { %s433_s14 = scalar_lea.vmem [#allocation8], %s2881_s18  ;;  %s4232_s20 = sadd.s32 1, %s3411_s23 }
  0x3b   : > { %s440_s12 = sshll.u32 %s433_s14, 4  ;;  %s3620_s11 = sshll.u32 %s431_s13, 6  ;;  %s3618_s12 = int_to_ptr.vmem [resolvable:$true] %s440_s12 }
  0x3c   : > { %s3616_s19 = scalar_select %p136_p6, %s3411_s23, %s4232_s20  }
  0x3d   : > { %s3622_s0 = scalar_lea.sflag [#allocation4], %s429_s21  ;;  %p4234_p12 = scmp.ne.s32.totalorder %s4227_s16, 0 }
  0x3e   : > { %4233 = sst [smem:[#allocation22_spill]] %s3616_s19 }
  0x3f   : > { %s3611_s24 = scalar_lea.hbm %s4231_s4, %s2882_s3  ;;  %p3628_p13 = pneg %p4234_p12 }
  0x40   : > { %s3155_s1 = scalar_lea.hbm %s3611_s24, 3072  ;;  %s3160_s18 = scalar_lea.hbm %s4231_s4, 6144 }
  0x41   : > { %p3156_p8 = scmp.ne.s32.totalorder %s3611_s24, %s3155_s1  ;;  %p3161_p4 = scmp.lt.u32.totalorder %s3611_s24, %s4231_s4 }
  0x42   : > { %p3162_p5 = scmp.lt.u32.totalorder %s3160_s18, %s3155_s1  ;;  %p3164_p9 = scmp.lt.u32.totalorder %s3155_s1, %s3611_s24 }
  0x43   : > { %p3158_p1 = pnand %p3628_p13, %p3156_p8 }
  0x44   : > { %p3163_p7 = por %p3162_p5, %p3161_p4 }
  0x45   : > { %p3159_p2 = pneg %p3158_p1 }
  0x46   : > { %p3165_p10 = por %p3164_p9, %p3163_p7 }
  0x48   : > { %p3166_p3 = pnand %p3165_p10, %p3159_p2 }
  0x4a   : > { %3169 = shalt.err (!%p3166_p3)
}
  0x4b   : > { %s3170_s21 = scalar_lea.vmem %s3618_s12, 3072  ;;  %s3428_s20 = smov [#allocation8]  }
  0x4c   : > { %p3171_p6 = scmp.ne.s32.totalorder %s3618_s12, %s3170_s21  ;;  %s3175_s5 = sshll.u32 %s3428_s20, 4  ;;  %s3176_s5 = int_to_ptr.vmem [resolvable:$false] %s3175_s5 }
  0x4d   : > { %s3177_s9 = scalar_lea.vmem %s3176_s5, 6144  ;;  %p3178_p11 = scmp.lt.s32.totalorder %s3618_s12, %s3176_s5 }
  0x4e   : > { %p3173_p8 = pnand %p3171_p6, %p3628_p13  ;;  %p3179_p0 = scmp.lt.s32.totalorder %s3177_s9, %s3170_s21 }
  0x50   : > { %p3174_p1 = pneg %p3173_p8  ;;  %p3180_p4 = por %p3179_p0, %p3178_p11 }
  0x52   : > { %p3181_p5 = pnand %p3180_p4, %p3174_p1 }
  0x54   : > { %3184 = shalt.err (!%p3181_p5)
}
  0x55   : > { %s3429_s1 = smov 192   ;;  %s3430_s18 = smov 12  }
  0x56   : > { %2922 = dma.hbm_to_vmem [thread:$0]  (!%p4234_p12), %s3611_s24, 3072, %s3618_s12, %s3622_s0, %s3429_s1, %s3429_s1, %s3430_s18  }
  0x57   : > { %s3653_s14 = sshll.u32 %s3419_s25, 10  ;;  %s4236_s6 = sld [smem:[#allocation28_spill]] }
  0x58   : > { %s461_s5 = scalar_lea.vmem [#allocation9], %s3620_s11 }
  0x59   : > { %s468_s9 = sshll.u32 %s461_s5, 4  ;;  %s3662_s9 = int_to_ptr.vmem [resolvable:$true] %s468_s9 }
  0x5d   : > { %s3659_s21 = scalar_lea.hbm %s4236_s6, %s3653_s14  ;;  %s3190_s1 = scalar_lea.hbm %s4236_s6, 2048 }
  0x5e   : > { %s3185_s4 = scalar_lea.hbm %s3659_s21, 1024  ;;  %p3191_p7 = scmp.lt.u32.totalorder %s3659_s21, %s4236_s6 }
  0x5f   : > { %p3186_p11 = scmp.ne.s32.totalorder %s3659_s21, %s3185_s4  ;;  %p3192_p9 = scmp.lt.u32.totalorder %s3190_s1, %s3185_s4 }
  0x60   : > { %p3194_p3 = scmp.lt.u32.totalorder %s3185_s4, %s3659_s21 }
  0x61   : > { %p3188_p0 = pnand %p3186_p11, %p3628_p13  ;;  %p3193_p10 = por %p3192_p9, %p3191_p7 }
  0x63   : > { %p3189_p2 = pneg %p3188_p0  ;;  %p3195_p6 = por %p3194_p3, %p3193_p10 }
  0x65   : > { %p3196_p8 = pnand %p3195_p6, %p3189_p2 }
  0x67   : > { %3199 = shalt.err (!%p3196_p8)
}
  0x68   : > { %s3200_s20 = scalar_lea.vmem %s3662_s9, 1024  ;;  %s3431_s5 = smov [#allocation9]  }
  0x69   : > { %p3201_p1 = scmp.ne.s32.totalorder %s3662_s9, %s3200_s20  ;;  %s3205_s24 = sshll.u32 %s3431_s5, 4  ;;  %s3206_s24 = int_to_ptr.vmem [resolvable:$false] %s3205_s24 }
  0x6a   : > { %s3207_s12 = scalar_lea.vmem %s3206_s24, 2048  ;;  %p3208_p11 = scmp.lt.s32.totalorder %s3662_s9, %s3206_s24 }
  0x6b   : > { %p3203_p4 = pnand %p3201_p1, %p3628_p13  ;;  %p3209_p0 = scmp.lt.s32.totalorder %s3207_s12, %s3200_s20 }
  0x6d   : > { %p3204_p5 = pneg %p3203_p4  ;;  %p3210_p7 = por %p3209_p0, %p3208_p11 }
  0x6f   : > { %p3211_p9 = pnand %p3210_p7, %p3204_p5 }
  0x71   : > { %3214 = shalt.err (!%p3211_p9)
}
  0x72   : > { %s4237_s4 = smov 4   ;;  %s4238_s1 = smov 64  }
  0x73   : > { %2925 = dma.hbm_to_vmem [thread:$0]  (!%p4234_p12), %s3659_s21, 1024, %s3662_s9, %s3622_s0, %s4238_s1, %s4238_s1, %s4237_s4  }
  0x74   : > { %s3432_s18 = smov [#allocation6]   ;;  %s3693_s20 = scalar_lea.hbm %s4189_s7, %s3653_s14 }
  0x75   : > { %s396_s13 = sshll.u32 %s3432_s18, 4  ;;  %s3215_s17 = scalar_lea.hbm %s4184_s2, 1024  ;;  %s397_s13 = int_to_ptr.vmem [resolvable:$true] %s396_s13 }
  0x76   : > { %p3216_p2 = scmp.ne.s32.totalorder %s4184_s2, %s3215_s17  ;;  %p4239_p10 = scmp.ne.s32.totalorder %s4229_s28, 0 }
  0x77   : > { %p3222_p8 = scmp.lt.u32.totalorder %s3215_s17, %s4184_s2 }
  0x78   : > { %p3218_p3 = pnand %p3216_p2, %p4239_p10 }
  0x7a   : > { %p3219_p6 = pneg %p3218_p3 }
  0x7c   : > { %p3224_p1 = pnand %p3222_p8, %p3219_p6 }
  0x7e   : > { %3227 = shalt.err (!%p3224_p1)
}
  0x7f   : > { %s3228_s18 = scalar_lea.vmem %s397_s13, 1024  ;;  %p3236_p0 = scmp.lt.s32.totalorder %s397_s13, %s397_s13 }
  0x80   : > { %p3229_p4 = scmp.ne.s32.totalorder %s397_s13, %s3228_s18  ;;  %p3237_p7 = scmp.lt.s32.totalorder %s3228_s18, %s3228_s18 }
  0x82   : > { %p3231_p5 = pnand %p3229_p4, %p4239_p10  ;;  %p3238_p9 = por %p3237_p7, %p3236_p0 }
  0x84   : > { %p3232_p11 = pneg %p3231_p5 }
  0x86   : > { %p3239_p12 = pnand %p3238_p9, %p3232_p11 }
  0x88   : > { %3242 = shalt.err (!%p3239_p12)
}
  0x89   : > { %p4240_p2 = scmp.ne.s32.totalorder %s4226_s15, 0  ;;  %s482_s17 = scalar_lea.vmem [#allocation10], %s3620_s11 }
  0x8a   : > { %s489_s19 = sshll.u32 %s482_s17, 4  ;;  %s3433_s5 = smov [#allocation12]   ;;  %s3717_s19 = int_to_ptr.vmem [resolvable:$true] %s489_s19 }
  0x8b   : > { %2915 = dma.hbm_to_vmem [thread:$0]  (!%p4240_p2), %s4184_s2, 1024, %s397_s13, [#allocation7], %s4238_s1, %s4238_s1, %s4237_s4  }
  0x8c   : > { %s3719_s24 = sshll.u32 %s3433_s5, 4  ;;  %s3243_s12 = scalar_lea.hbm %s3693_s20, 1024  ;;  %s413_s24 = int_to_ptr.vmem [resolvable:$true] %s3719_s24 }
  0x8d   : > { %p3244_p12 = scmp.ne.s32.totalorder %s3693_s20, %s3243_s12  ;;  %s3248_s18 = scalar_lea.hbm %s4189_s7, 2048 }
  0x8e   : > { %p3249_p8 = scmp.lt.u32.totalorder %s3693_s20, %s4189_s7  ;;  %p3250_p1 = scmp.lt.u32.totalorder %s3248_s18, %s3243_s12 }
  0x8f   : > { %p3246_p3 = pnand %p3244_p12, %p3628_p13  ;;  %p3252_p5 = scmp.lt.u32.totalorder %s3243_s12, %s3693_s20 }
  0x90   : > { %p3251_p4 = por %p3250_p1, %p3249_p8 }
  0x91   : > { %p3247_p6 = pneg %p3246_p3 }
  0x92   : > { %p3253_p11 = por %p3252_p5, %p3251_p4 }
  0x94   : > { %p3254_p0 = pnand %p3253_p11, %p3247_p6 }
  0x96   : > { %3257 = shalt.err (!%p3254_p0)
}
  0x97   : > { %s3258_s13 = scalar_lea.vmem %s3717_s19, 1024  ;;  %s3434_s17 = smov [#allocation10]  }
  0x98   : > { %p3259_p7 = scmp.ne.s32.totalorder %s3717_s19, %s3258_s13  ;;  %s3263_s5 = sshll.u32 %s3434_s17, 4  ;;  %s3264_s5 = int_to_ptr.vmem [resolvable:$false] %s3263_s5 }
  0x99   : > { %s3265_s21 = scalar_lea.vmem %s3264_s5, 2048  ;;  %p3266_p3 = scmp.lt.s32.totalorder %s3717_s19, %s3264_s5 }
  0x9a   : > { %p3261_p9 = pnand %p3259_p7, %p3628_p13  ;;  %p3267_p2 = scmp.lt.s32.totalorder %s3265_s21, %s3258_s13 }
  0x9c   : > { %p3262_p12 = pneg %p3261_p9  ;;  %p3268_p8 = por %p3267_p2, %p3266_p3 }
  0x9e   : > { %p3269_p1 = pnand %p3268_p8, %p3262_p12 }
  0xa0   : > { %3272 = shalt.err (!%p3269_p1)
}
  0xa1   : > { %p4241_p6 = scmp.ne.s32.totalorder %s4227_s16, 0  ;;  %s3273_s18 = scalar_lea.hbm %s4192_s10, 1024 }
  0xa2   : > { %p3274_p2 = scmp.ne.s32.totalorder %s4192_s10, %s3273_s18  ;;  %p3280_p11 = scmp.lt.u32.totalorder %s3273_s18, %s4192_s10 }
  0xa3   : > { %2928 = dma.hbm_to_vmem [thread:$0]  (!%p4241_p6), %s3693_s20, 1024, %s3717_s19, %s3622_s0, %s4238_s1, %s4238_s1, %s4237_s4  }
  0xa4   : > { %p3276_p4 = pnand %p3274_p2, %p4239_p10 }
  0xa6   : > { %p3277_p5 = pneg %p3276_p4 }
  0xa8   : > { %p3282_p0 = pnand %p3280_p11, %p3277_p5 }
  0xaa   : > { %3285 = shalt.err (!%p3282_p0)
}
  0xab   : > { %s3286_s5 = scalar_lea.vmem %s413_s24, 1024  ;;  %p3294_p3 = scmp.lt.s32.totalorder %s413_s24, %s413_s24 }
  0xac   : > { %p3287_p7 = scmp.ne.s32.totalorder %s413_s24, %s3286_s5  ;;  %p3295_p8 = scmp.lt.s32.totalorder %s3286_s5, %s3286_s5 }
  0xae   : > { %p3289_p9 = pnand %p3287_p7, %p4239_p10  ;;  %p3296_p1 = por %p3295_p8, %p3294_p3 }
  0xb0   : > { %p3290_p12 = pneg %p3289_p9 }
  0xb2   : > { %p3297_p6 = pnand %p3296_p1, %p3290_p12 }
  0xb4   : > { %3300 = shalt.err (!%p3297_p6)
}
  0xb5   : > { %p4242_p2 = scmp.ne.s32.totalorder %s4226_s15, 0  ;;  %s3772_s12 = scalar_lea.hbm %s4190_s8, %s3653_s14 }
  0xb6   : > { %s503_s15 = scalar_lea.vmem [#allocation11], %s3620_s11  ;;  %s3301_s18 = scalar_lea.hbm %s3772_s12, 1024 }
  0xb7   : > { %2918 = dma.hbm_to_vmem [thread:$0]  (!%p4242_p2), %s4192_s10, 1024, %s413_s24, [#allocation7], %s4238_s1, %s4238_s1, %s4237_s4  }
  0xb8   : > { %s510_s9 = sshll.u32 %s503_s15, 4  ;;  %p3302_p10 = scmp.ne.s32.totalorder %s3772_s12, %s3301_s18  ;;  %s3775_s9 = int_to_ptr.vmem [resolvable:$true] %s510_s9 }
  0xb9   : > { %s3306_s25 = scalar_lea.hbm %s4190_s8, 2048  ;;  %p3307_p5 = scmp.lt.u32.totalorder %s3772_s12, %s4190_s8 }
  0xba   : > { %p3304_p6 = pnand %p3302_p10, %p3628_p13  ;;  %p3308_p11 = scmp.lt.u32.totalorder %s3306_s25, %s3301_s18 }
  0xbb   : > { %p3310_p7 = scmp.lt.u32.totalorder %s3301_s18, %s3772_s12 }
  0xbc   : > { %p3305_p4 = pneg %p3304_p6  ;;  %p3309_p0 = por %p3308_p11, %p3307_p5 }
  0xbe   : > { %p3311_p9 = por %p3310_p7, %p3309_p0 }
  0xc0   : > { %p3312_p12 = pnand %p3311_p9, %p3305_p4 }
  0xc2   : > { %3315 = shalt.err (!%p3312_p12)
}
  0xc3   : > { %s3316_s11 = scalar_lea.vmem %s3775_s9, 1024  ;;  %s3435_s17 = smov [#allocation11]  }
  0xc4   : > { %p3317_p3 = scmp.ne.s32.totalorder %s3775_s9, %s3316_s11  ;;  %s3321_s5 = sshll.u32 %s3435_s17, 4  ;;  %s3322_s5 = int_to_ptr.vmem [resolvable:$false] %s3321_s5 }
  0xc5   : > { %s3323_s20 = scalar_lea.vmem %s3322_s5, 2048  ;;  %p3324_p2 = scmp.lt.s32.totalorder %s3775_s9, %s3322_s5 }
  0xc6   : > { %p3319_p8 = pnand %p3317_p3, %p3628_p13  ;;  %p3325_p10 = scmp.lt.s32.totalorder %s3323_s20, %s3316_s11 }
  0xc8   : > { %p3320_p1 = pneg %p3319_p8  ;;  %p3326_p6 = por %p3325_p10, %p3324_p2 }
  0xca   : > { %p3327_p5 = pnand %p3326_p6, %p3320_p1 }
  0xcc   : > { %3330 = shalt.err (!%p3327_p5)
}
  0xcd   : > { %p4243_p4 = scmp.ne.s32.totalorder %s4227_s16, 0  ;;  %p4244_p13 = scmp.ne.s32.totalorder %s4225_s30, 0 }
  0xce   : > { %p4245_p11 = scmp.eq.s32.totalorder (!%p4244_p13), %s3540_s27, 0 }
  0xcf   : > { %2931 = dma.hbm_to_vmem [thread:$0]  (!%p4243_p4), %s3772_s12, 1024, %s3775_s9, %s3622_s0, %s4238_s1, %s4238_s1, %s4237_s4  }
  0xd0   : > { %529 = sbr.rel (%p4244_p13) target bundleno = 3925 (0xf55), region = 68 }
  0xd7   : > { %3382 = dma.done.wait (%p4245_p11), [#allocation4], 128   ;;  %p4246_p0 = pmov %p4245_p11 }
  0xd9   : > { %3384 = vsyncadd (%p4246_p0), [#allocation4], 4294967168  ;;  %p4247_p7 = pmov %p4246_p0 }
  0xda   : > { %p4248_p9 = pmov %p4246_p0 }
  0xdb   : > { %3386 = dma.done.wait (%p4247_p7), [#allocation7], 1024  }
  0xdc   : > { %3388 = vsyncadd (%p4248_p9), [#allocation7], 4294966272  ;;  %s539_s16 = sand.u32 1, %s3540_s27   ;;  %s541_s0 = sand.u32 1, %s3407_s22  }
  0xdd   : > { %s2883_s3 = smul.u32 192, %s541_s0  ;;  %s540_s30 = scalar_lea.sflag [#allocation4], %s539_s16 }
  0xde   : > { %p4249_p12 = scmp.ne.s32.totalorder %s4224_s29, 0 }
  0xdf   : > { %s3814_s4 = scalar_lea.vmem [#allocation8], %s2883_s3 }
  0xe0   : > { %3390 = dma.done.wait (%p4249_p12), %s540_s30, 6144  }
  0xe1   : > { %3392 = vsyncadd (%p4249_p12), %s540_s30, 4294961152  ;;  %s2499_s1 = sshll.u32 %s541_s0, 6  ;;  %p4250_p3 = pmov %p4246_p0 }
  0xe2   : > { %s3820_s19 = scalar_lea.vmem [#allocation9], %s2499_s1  ;;  %s3822_s28 = scalar_lea.vmem [#allocation10], %s2499_s1 }
  0xe3   : > { %s3824_s21 = scalar_lea.vmem [#allocation11], %s2499_s1 }
  0xe4   : > { %3394 = dma.done.wait (%p4250_p3), [#allocation7], 1024   ;;  %p4251_p8 = pmov %p4246_p0 }
  0xe5   : > { %s4252_s12 = sld [smem:[#allocation19_spill]]  ;;  %s4253_s24 = sld [smem:[#allocation29_spill]] }
  0xe6   : > { %3396 = vsyncadd (%p4251_p8), [#allocation7], 4294966272  ;;  %s4254_s11 = sld [smem:[#allocation27_spill]] }
  0xeb   : > { %p643_p1 = scmp.lt.s32.totalorder %s4252_s12, 1  ;;  %p2504_p2 = scmp.ne.s32.totalorder %s4252_s12, 0 }
  0xec   : > { %v3006_v0 = vld [vmem:[#allocation6] sm:$0xff] (!%p2504_p2)   ;;  %v3436_v1 = vmov (!%p2504_p2), 0.0   ;;  %v3007_v2 = vld [vmem:[#allocation6 + $0x8] sm:$0xff] (!%p2504_p2)   ;;  %vm3437_vm0 = vmmov (!%p2504_p2), 0   ;;  %v3008_v3 = vld [vmem:[#allocation6 + $0x10] sm:$0xff] (!%p2504_p2)   ;;  %s4255_s16 = sld [smem:[#allocation25_spill]] (!%p2504_p2) }
  0xed   : > { %s644_s15 = scalar_select %p643_p1, %s4252_s12, 1 }
  0xee   : > { %656 = sbr.rel (%p2504_p2) target bundleno = 487 (0x1e7), region = 100  ;;  %2680 = vmatprep.subr.bf16.mxu0 (!%p2504_p2), %v3436_v1  ;;  %2696 = vmatprep.mubr.msk.bf16.mxu0 (!%p2504_p2), %vm3437_vm0, %v3436_v1  ;;  %v3009_v4 = vld [vmem:[#allocation6 + $0x18] sm:$0xff] (!%p2504_p2)   ;;  %v3010_v5 = vld [vmem:[#allocation6 + $0x20] sm:$0xff] (!%p2504_p2)   ;;  %v3011_v6 = vld [vmem:[#allocation6 + $0x28] sm:$0xff] (!%p2504_p2)  }
  0xef   : > { %s2884_s9 = smul.u32 3, %s644_s15  ;;  %s2503_s29 = sshll.u32 %s644_s15, 3  ;;  %2681 = vmatpush3.bf16.msra.mxu0 (!%p2504_p2), %v3006_v0  ;;  %v3012_v7 = vld [vmem:[#allocation6 + $0x30] sm:$0xff] (!%p2504_p2)   ;;  %v3013_v8 = vld [vmem:[#allocation6 + $0x38] sm:$0xff] (!%p2504_p2)  }
  0xf0   : > { %s3835_s25 = scalar_lea.vmem %s4253_s24, %s2503_s29  ;;  %2682 = vmatprep.subr.bf16.mxu0 (!%p2504_p2), %v3436_v1  ;;  %v3014_v9 = vld [vmem:[#allocation3] sm:$0xff] (!%p2504_p2)  }
  0xf1   : > { %s3840_s17 = scalar_lea.vmem %s4254_s11, %s2884_s9 }
  0xf2   : > { %v2505_v10 = vld [vmem:[%s4255_s16] ss:$0 sm:$0xff] (!%p2504_p2) }
  0xf3   : > { %2683 = vmatpush3.bf16.msra.mxu0 (!%p2504_p2), %v3007_v2 }
  0xf4   : > { %2684 = vmatprep.subr.bf16.mxu0 (!%p2504_p2), %v3436_v1 }
  0xf7   : > { %2685 = vmatpush3.bf16.msra.mxu0 %v3008_v3 }
  0xf8   : > { %2686 = vmatprep.subr.bf16.mxu0 %v3436_v1 }
  0xfb   : > { %2687 = vmatpush3.bf16.msra.mxu0 %v3009_v4 }
  0xfc   : > { %2688 = vmatprep.subr.bf16.mxu0 %v3436_v1 }
  0xff   : > { %2689 = vmatpush3.bf16.msra.mxu0 %v3010_v5 }
 0x100   : > { %2690 = vmatprep.subr.bf16.mxu0 %v3436_v1 }
 0x103   : > { %2691 = vmatpush3.bf16.msra.mxu0 %v3011_v6 }
 0x104   : > { %2692 = vmatprep.subr.bf16.mxu0 %v3436_v1 }
 0x107   : > { %2693 = vmatpush3.bf16.msra.mxu0 %v3012_v7 }
 0x108   : > { %2694 = vmatprep.subr.bf16.mxu0 %v3436_v1 }
 0x10b   : > { %2695 = vmatpush3.bf16.msra.mxu0 %v3013_v8 }
 0x10e   : > { %2697 = vmatmul.mubr.bf16.vlgmr.msra.gmra.mrb[0].mxu0 %v3014_v9 }
 0x1e1   : > { %v770_v11 = vpop.f32.mrb[0].mxu0 }
 0x1e2   : > { %v771_v12 = vadd.f32 %v2505_v10, %v770_v11  ;;  %v2698_v13 = vpop.f32.mrb[1].mxu0 }
 0x1e3   : > { %v773_v14 = vpop.f32.mrb[2].mxu0 }
 0x1e4   : > { %777 = vst [vmem:[#allocation2] sm:$0xff] %v771_v12  ;;  %v774_v15 = vadd.f32 %v2505_v10, %v773_v14  ;;  %v2699_v16 = vpop.f32.mrb[3].mxu0 }
 0x1e6   : > { %778 = vst [vmem:[#allocation2 + $0x8] sm:$0xff] %v774_v15 }
 0x1e7 PF: > { %v3015_v17 = vld [vmem:[%s3814_s4 + $0x4] ss:$12 sps:$4 sm:$0xff]   ;;  %v3017_v18 = vld [vmem:[%s3814_s4] ss:$12 sps:$4 sm:$0xff]   ;;  %v3438_v19 = vmov 0.0   ;;  %v3439_v20 = vmov 0   ;;  %v817_v46 = vlaneseq }
 0x1e8   : > { %2700 = vmatprep.subr.bf16.mxu1 %v3438_v19  ;;  %992 = vmatprep.mubr.bf16.mxu0 %v3439_v20  ;;  %v3018_v21 = vld [vmem:[%s3814_s4 + $0x1c] ss:$12 sps:$4 sm:$0xff]   ;;  %vm3440_vm1 = vmmov 0   ;;  %v3020_v22 = vld [vmem:[%s3814_s4 + $0x18] ss:$12 sps:$4 sm:$0xff]   ;;  %vm1211_vm12 = vcmask 1043456  }
 0x1e9   : > { %960 = vmatprep.subr.bf16.mxu0 %v3015_v17  ;;  %2716 = vmatprep.mubr.msk.bf16.mxu1 %vm3440_vm1, %v3438_v19  ;;  %v3021_v23 = vld [vmem:[%s3814_s4 + $0x34] ss:$12 sps:$4 sm:$0xff]   ;;  %v3024_v26 = vld [vmem:[%s3814_s4 + $0x30] ss:$12 sps:$4 sm:$0xff]   ;;  %v3025_v27 = vld [vmem:[%s3814_s4 + $0x4c] ss:$12 sps:$4 sm:$0xff]  }
 0x1ea   : > { %961 = vmatpush1.bf16.msra.mxu0 %v3017_v18  ;;  %v3023_v24 = vld [vmem:[%s3814_s4 + $0x8] ss:$12 sps:$4 sm:$0xff]   ;;  %v3027_v25 = vld [vmem:[%s3814_s4 + $0x20] ss:$12 sps:$4 sm:$0xff]   ;;  %v3031_v28 = vld [vmem:[%s3814_s4 + $0x38] ss:$12 sps:$4 sm:$0xff]  }
 0x1eb   : > { %962 = vmatprep.subr.bf16.mxu0 %v3018_v21  ;;  %2701 = vmatpush3.bf16.msra.mxu1 %v3023_v24  ;;  %v3028_v29 = vld [vmem:[%s3814_s4 + $0x48] ss:$12 sps:$4 sm:$0xff]   ;;  %v3029_v30 = vld [vmem:[%s3814_s4 + $0x64] ss:$12 sps:$4 sm:$0xff]   ;;  %v3032_v32 = vld [vmem:[%s3814_s4 + $0x60] ss:$12 sps:$4 sm:$0xff]  }
 0x1ec   : > { %2702 = vmatprep.subr.bf16.mxu1 %v3438_v19  ;;  %v3035_v31 = vld [vmem:[%s3814_s4 + $0x50] ss:$12 sps:$4 sm:$0xff]   ;;  %v3039_v34 = vld [vmem:[%s3814_s4 + $0x68] ss:$12 sps:$4 sm:$0xff]   ;;  %v3036_v35 = vld [vmem:[%s3814_s4 + $0x78] ss:$12 sps:$4 sm:$0xff]  }
 0x1ed   : > { %v3033_v33 = vld [vmem:[%s3814_s4 + $0x7c] ss:$12 sps:$4 sm:$0xff]   ;;  %v3037_v36 = vld [vmem:[%s3814_s4 + $0x94] ss:$12 sps:$4 sm:$0xff]   ;;  %v3041_v39 = vld [vmem:[%s3814_s4 + $0xac] ss:$12 sps:$4 sm:$0xff]  }
 0x1ee   : > { %963 = vmatpush1.bf16.msra.mxu0 %v3020_v22  ;;  %v3043_v37 = vld [vmem:[%s3814_s4 + $0x80] ss:$12 sps:$4 sm:$0xff]   ;;  %v3040_v38 = vld [vmem:[%s3814_s4 + $0x90] ss:$12 sps:$4 sm:$0xff]   ;;  %v3045_v40 = vld [vmem:[%s3814_s4 + $0x98] ss:$12 sps:$4 sm:$0xff]  }
 0x1ef   : > { %964 = vmatprep.subr.bf16.mxu0 %v3021_v23  ;;  %2703 = vmatpush3.bf16.msra.mxu1 %v3027_v25  ;;  %v3044_v41 = vld [vmem:[%s3814_s4 + $0xa8] ss:$12 sps:$4 sm:$0xff]   ;;  %v3046_v44 = vld [vmem:[%s3814_s4 + $0xb0] ss:$12 sps:$4 sm:$0xff]   ;;  %v3889_v47 = vshrl.u32 %v817_v46, 7  ;;  %v3891_v48 = vand.u32 127, %v817_v46 }
 0x1f0   : > { %2704 = vmatprep.subr.bf16.mxu1 %v3438_v19  ;;  %v3877_v42 = vld [vmem:[#allocation2] sm:$0xff]  ;;  %v3879_v43 = vld [vmem:[#allocation2 + $0x8] sm:$0xff]  ;;  %v815_v50 = vld [vmem:[%s3840_s17] sm:$0x7]  ;;  %s4256_s30 = sld [smem:[#allocation24_spill]]  ;;  %vm1151_vm13 = vcmask 64512  }
 0x1f1   : > { %v781_v45 = vpack.c.bf16 %v3879_v43, %v3877_v42  ;;  %v819_v49 = vsub.s32 0, %v3889_v47  ;;  %v823_v51 = vsub.s32 1, %v3889_v47  ;;  %vm1047_vm2 = vcmp.ge.s32.totalorder %v3891_v48, 8 }
 0x1f2   : > { %965 = vmatpush1.bf16.msra.mxu0 %v3024_v26  ;;  %vm1051_vm3 = vcmp.lt.s32.totalorder %v3891_v48, 16  ;;  %v827_v52 = vsub.s32 2, %v3889_v47  ;;  %vm1050_vm4 = vcmp.lt.s32.totalorder %v3891_v48, 8  ;;  %vm1048_vm5 = vcmp.ge.s32.totalorder %v3891_v48, 16 }
 0x1f3   : > { %966 = vmatprep.subr.bf16.mxu0 %v3025_v27  ;;  %2705 = vmatpush3.bf16.msra.mxu1 %v3031_v28  ;;  %v820_v53 = vrot.slane %v815_v50, %v819_v49  ;;  %vm1052_vm6 = vcmp.lt.s32.totalorder %v3891_v48, 24  ;;  %v824_v54 = vrot.slane %v815_v50, %v823_v51  ;;  %vm1055_vm7 = vmand %vm1047_vm2, %vm1051_vm3  ;;  %vm1049_vm8 = vcmp.ge.s32.totalorder %v3891_v48, 24 }
 0x1f4   : > { %2706 = vmatprep.subr.bf16.mxu1 %v3438_v19  ;;  %vm1053_vm9 = vcmp.lt.s32.totalorder %v3891_v48, 32  ;;  %v3910_v56 = vrot.slane %v815_v50, %v827_v52  ;;  %v3913_v57 = vsel %vm1050_vm4, 1.0, %v3438_v19  ;;  %vm1056_vm10 = vmand %vm1048_vm5, %vm1052_vm6  ;;  %v3916_v60 = vsel %vm1055_vm7, 1.0, %v3438_v19 }
 0x1f5   : > { %vm1057_vm11 = vmand %vm1049_vm8, %vm1053_vm9  ;;  %v3928_v7 = vsel %vm1056_vm10, 1.0, %v3438_v19 }
 0x1f6   : > { %967 = vmatpush1.bf16.msra.mxu0 %v3028_v29  ;;  %v3931_v8 = vsel %vm1057_vm11, 1.0, %v3438_v19  ;;  %v2545_v20 = vld [vmem:[%s4256_s30] ss:$0 sm:$0xff] }
 0x1f7   : > { %968 = vmatprep.subr.bf16.mxu0 %v3029_v30  ;;  %2707 = vmatpush3.bf16.msra.mxu1 %v3035_v31 }
 0x1f8   : > { %2708 = vmatprep.subr.bf16.mxu1 %v3438_v19 }
 0x1fa   : > { %969 = vmatpush1.bf16.msra.mxu0 %v3032_v32 }
 0x1fb   : > { %970 = vmatprep.subr.bf16.mxu0 %v3033_v33  ;;  %2709 = vmatpush3.bf16.msra.mxu1 %v3039_v34 }
 0x1fc   : > { %2710 = vmatprep.subr.bf16.mxu1 %v3438_v19 }
 0x1fe   : > { %971 = vmatpush1.bf16.msra.mxu0 %v3036_v35 }
 0x1ff   : > { %972 = vmatprep.subr.bf16.mxu0 %v3037_v36  ;;  %2711 = vmatpush3.bf16.msra.mxu1 %v3043_v37 }
 0x200   : > { %2712 = vmatprep.subr.bf16.mxu1 %v3438_v19 }
 0x202   : > { %973 = vmatpush1.bf16.msra.mxu0 %v3040_v38 }
 0x203   : > { %974 = vmatprep.subr.bf16.mxu0 %v3041_v39  ;;  %2713 = vmatpush3.bf16.msra.mxu1 %v3045_v40 }
 0x204   : > { %2714 = vmatprep.subr.bf16.mxu1 %v3438_v19 }
 0x206   : > { %975 = vmatpush1.bf16.msra.mxu0 %v3044_v41 }
 0x207   : > { %2715 = vmatpush3.bf16.msra.mxu1 %v3046_v44 }
 0x208   : > { %2732 = vmatprep.subr.bf16.mxu1 %v3438_v19 }
 0x209   : > { %993 = vmatmul.mubr.bf16.vlgmr.msra.gmra.mrb[0].mxu0 %v781_v45 }
 0x20a   : > { %2717 = vmatmul.mubr.bf16.vlgmr.msra.gmra.mrb[0].mxu1 %v781_v45 }
 0x20b   : > { %2734 = vmatprep.mubr.msk.bf16.mxu1 %vm3440_vm1, %v3438_v19 }
 0x2dc   : > { %v994_v55 = vpop.f32.mrb[0].mxu0 }
 0x2dd   : > { %v995_v58 = vadd.f32 %v994_v55, %v820_v53  ;;  %v996_v59 = vpop.f32.mrb[1].mxu0  ;;  %v1037_v1 = vpop.f32.mrb[0].mxu1 }
 0x2de   : > { %v997_v61 = vadd.f32 %v996_v59, %v824_v54  ;;  %v998_v62 = vpop.f32.mrb[2].mxu0  ;;  %v3924_v4 = vadd.f32 %v1037_v1, %v3910_v56  ;;  %v2718_v6 = vpop.f32.mrb[1].mxu1 }
 0x2df   : > { %v3920_v63 = vadd.f32 %v998_v62, %v820_v53  ;;  %v1000_v0 = vpop.f32.mrb[3].mxu0  ;;  %v1066_v2 = vmul.f32 %v3913_v57, %v995_v58  ;;  %v1067_v5 = vmul.f32 %v3916_v60, %v995_v58  ;;  %v1068_v11 = vmul.f32 %v3928_v7, %v995_v58  ;;  %v1040_v33 = vpop.f32.mrb[2].mxu1 }
 0x2e0   : > { %v1074_v3 = vpack.c.bf16 %v997_v61, %v997_v61  ;;  %v1196_v10 = vmul.f32 %v3913_v57, %v3924_v4  ;;  %v1069_v12 = vmul.f32 %v3931_v8, %v995_v58  ;;  %v1001_v14 = vadd.f32 %v1000_v0, %v824_v54  ;;  %v2719_v34 = vpop.f32.mrb[3].mxu1 }
 0x2e1   : > { %v2600_v9 = vpack.c.bf16 %v1067_v5, %v1066_v2  ;;  %v1197_v40 = vmul.f32 %v3916_v60, %v3924_v4  ;;  %v1396_v50 = vmul.f32 %v3913_v57, %v3920_v63  ;;  %v1397_v53 = vmul.f32 %v3916_v60, %v3920_v63 }
 0x2e2   : > { %2720 = vmatprep.subr.bf16.mxu0 %v1074_v3  ;;  %v1200_v13 = vpack.c.bf16 %v1196_v10, %v1196_v10  ;;  %v2601_v15 = vpack.c.bf16 %v1069_v12, %v1068_v11  ;;  %v1404_v17 = vpack.c.bf16 %v1001_v14, %v1001_v14  ;;  %v3961_v54 = vadd.f32 %v1040_v33, %v3910_v56  ;;  %v2553_v10 = vld [vmem:[%s4256_s30 + $0x1] ss:$0 sm:$0xff] }
 0x2e3   : > { %2721 = vmatpush3.bf16.xpose.msra.mxu0 %v1074_v3  ;;  %2722 = vmatprep.mubr.bf16.mxu0 %v2600_v9  ;;  %v1201_v41 = vpack.c.bf16 %v1197_v40, %v1197_v40  ;;  %v2602_v59 = vpack.c.bf16 %v1397_v53, %v1396_v50  ;;  %v1398_v62 = vmul.f32 %v3928_v7, %v3920_v63 }
 0x2e4   : > { %2726 = vmatprep.subr.bf16.mxu0 %v3438_v19  ;;  %v1213_v16 = vsel %vm1211_vm12, %v1200_v13, 0  ;;  %v1526_v61 = vmul.f32 %v3913_v57, %v3961_v54  ;;  %v1399_v0 = vmul.f32 %v3931_v8, %v3920_v63 }
 0x2e5   : > { %v1259_v44 = vsel %vm1211_vm12, %v1201_v41, 0 }
 0x2e6   : > { %2733 = vmatpush3.bf16.msra.mxu1 %v1259_v44  ;;  %v1530_v56 = vpack.c.bf16 %v1526_v61, %v1526_v61  ;;  %v2603_v1 = vpack.c.bf16 %v1399_v0, %v1398_v62 }
 0x2e7   : > { %2738 = vmatprep.subr.bf16.mxu1 %v3438_v19 }
 0x2e8   : > { %v1542_v2 = vsel %vm1211_vm12, %v1530_v56, 0 }
 0x2ea   : > { %2723 = vmatmul.mubr.bf16.vlgmr.msra.gmra.mrb[4].mxu0 %v2601_v15 }
 0x2eb   : > { %2727 = vmatpush3.bf16.msra.mxu0 %v1213_v16  ;;  %2728 = vmatprep.mubr.msk.bf16.mxu0 %vm3440_vm1, %v3438_v19 }
 0x2ec   : > { %2750 = vmatprep.subr.bf16.mxu0 %v1404_v17 }
 0x3bd   : > { %v2724_v18 = vpop.f32.mrb[4].mxu0 }
 0x3be   : > { %v1138_v21 = vmul.f32 0.35355338, %v2724_v18  ;;  %v1121_v22 = vpop.f32.mrb[5].mxu0 }
 0x3bf   : > { %v1136_v23 = vmul.f32 0.35355338, %v1121_v22  ;;  %v2725_v24 = vpop.f32.mrb[6].mxu0 }
 0x3c0   : > { %v1139_v25 = vmul.f32 0.35355338, %v2725_v24  ;;  %v1124_v26 = vpop.f32.mrb[7].mxu0  ;;  %v3944_v27 = vadd.f32 %v2545_v20, %v1138_v21 }
 0x3c1   : > { %v1137_v28 = vmul.f32 0.35355338, %v1124_v26  ;;  %v1147_v29 = vadd.f32 %v2545_v20, %v1136_v23 }
 0x3c2   : > { %v3946_v30 = vadd.f32 %v2545_v20, %v1139_v25  ;;  %v1158_v26 = vsel %vm1151_vm13, %v3944_v27, -inf }
 0x3c3   : > { %v1152_v31 = vsel %vm1151_vm13, %v1147_v29, -inf  ;;  %v3949_v32 = vadd.f32 %v2545_v20, %v1137_v28 }
 0x3c4   : > { %1153 = vmax.xlane.f32.xlu0 %v1152_v31 }
 0x3c5   : > { %v1155_v23 = vsel %vm1151_vm13, %v3949_v32, -inf }
 0x451   : > { %v1154_v35 = vpop.xlane.xlu0 %1153 }
 0x452   : > { %v1164_v36 = vsub.f32 %v1147_v29, %v1154_v35  ;;  %v1161_v29 = vsel %vm1151_vm13, %v3946_v30, -inf }
 0x454   : > { %v1168_v37 = vmul.f32 1.442695, %v1164_v36 }
 0x456   : > { %3071 = vpow2.f32 %v1168_v37 }
 0x460   : > { %v3072_v38 = vpop.eup %3071 }
 0x461   : > { %v1176_v39 = vsel %vm1151_vm13, %v3072_v38, 0.0 }
 0x462   : > { %1177 = vadd.xlane.f32.xlu0 %v1176_v39 }
 0x4ef   : > { %v1178_v45 = vpop.xlane.xlu0 %1177 }
 0x4f0   : > { %3073 = vrcp.f32 %v1178_v45 }
 0x4fa   : > { %v3074_v46 = vpop.eup %3073 }
 0x4fb   : > { %v1192_v55 = vmul.f32 %v3074_v46, %v3072_v38 }
 0x4fd   : > { %v1204_v58 = vpack.c.bf16 %v1192_v55, %v1192_v55 }
 0x4ff   : > { %2729 = vmatmul.mubr.msk.bf16.vlgmr.msra.gmra.mrb[8].mxu0 %vm1151_vm13, %v1204_v58 }
 0x500   : > { %2751 = vmatpush3.bf16.xpose.msra.mxu0 %v1404_v17  ;;  %2752 = vmatprep.mubr.bf16.mxu0 %v2602_v59 }
 0x501   : > { %2756 = vmatprep.subr.bf16.mxu0 %v3438_v19 }
 0x507   : > { %2753 = vmatmul.mubr.bf16.vlgmr.msra.gmra.mrb[12].mxu0 %v2603_v1 }
 0x508   : > { %2757 = vmatpush3.bf16.msra.mxu0 %v1542_v2  ;;  %2758 = vmatprep.mubr.msk.bf16.mxu0 %vm3440_vm1, %v3438_v19 }
 0x509   : > { %2762 = vmatprep.subr.bf16.mxu0 %v3438_v19 }
 0x5d2   : > { %v3975_v57 = vpop.f32.mrb[8].mxu0 }
 0x5d3   : > { %v2730_v3 = vpop.f32.mrb[9].mxu0 }
 0x5d4   : > { %v1252_v5 = vpop.f32.mrb[10].mxu0 }
 0x5d5   : > { %v2731_v6 = vpop.f32.mrb[11].mxu0 }
 0x5da   : > { %v2754_v9 = vpop.f32.mrb[12].mxu0 }
 0x5db   : > { %v1451_v63 = vpop.f32.mrb[13].mxu0  ;;  %v1468_v14 = vmul.f32 0.35355338, %v2754_v9 }
 0x5dc   : > { %v1466_v11 = vmul.f32 0.35355338, %v1451_v63  ;;  %v2755_v12 = vpop.f32.mrb[14].mxu0 }
 0x5dd   : > { %v1454_v13 = vpop.f32.mrb[15].mxu0  ;;  %v1469_v20 = vmul.f32 0.35355338, %v2755_v12  ;;  %v1480_v22 = vadd.f32 %v2553_v10, %v1468_v14 }
 0x5de   : > { %v1467_v15 = vmul.f32 0.35355338, %v1454_v13  ;;  %v1478_v16 = vadd.f32 %v2553_v10, %v1466_v11 }
 0x5df   : > { %v1488_v24 = vsel %vm1151_vm13, %v1480_v22, -inf  ;;  %v1481_v25 = vadd.f32 %v2553_v10, %v1469_v20 }
 0x5e0   : > { %v1482_v17 = vsel %vm1151_vm13, %v1478_v16, -inf  ;;  %v1479_v18 = vadd.f32 %v2553_v10, %v1467_v15 }
 0x5e1   : > { %1483 = vmax.xlane.f32.xlu1 %v1482_v17  ;;  %v1491_v28 = vsel %vm1151_vm13, %v1481_v25, -inf }
 0x5e2   : > { %v1485_v21 = vsel %vm1151_vm13, %v1479_v18, -inf }
 0x5e3   : > { %1486 = vmax.xlane.f32.xlu0 %v1485_v21 }
 0x5e5   : > { %1156 = vmax.xlane.f32.xlu1 %v1155_v23 }
 0x5e7   : > { %1489 = vmax.xlane.f32.xlu0 %v1488_v24 }
 0x5e9   : > { %1159 = vmax.xlane.f32.xlu1 %v1158_v26 }
 0x5eb   : > { %1492 = vmax.xlane.f32.xlu0 %v1491_v28 }
 0x5ed   : > { %1162 = vmax.xlane.f32.xlu1 %v1161_v29 }
 0x66e   : > { %v1484_v31 = vpop.xlane.xlu1 %1483 }
 0x66f   : > { %v1494_v33 = vsub.f32 %v1478_v16, %v1484_v31  ;;  %v1527_v16 = vmul.f32 %v3916_v60, %v3961_v54 }
 0x670   : > { %v1487_v34 = vpop.xlane.xlu0 %1486 }
 0x671   : > { %v1498_v35 = vmul.f32 1.442695, %v1494_v33  ;;  %v1495_v36 = vsub.f32 %v1479_v18, %v1487_v34  ;;  %v1531_v21 = vpack.c.bf16 %v1527_v16, %v1527_v16  ;;  %v1528_v34 = vmul.f32 %v3928_v7, %v3961_v54 }
 0x672   : > { %v1157_v37 = vpop.xlane.xlu1 %1156 }
 0x673   : > { %3075 = vpow2.f32 %v1498_v35  ;;  %v1500_v38 = vmul.f32 1.442695, %v1495_v36  ;;  %v1165_v39 = vsub.f32 %v3949_v32, %v1157_v37  ;;  %v1588_v26 = vsel %vm1211_vm12, %v1531_v21, 0 }
 0x674   : > { %v1490_v40 = vpop.xlane.xlu0 %1489 }
 0x675   : > { %3077 = vpow2.f32 %v1500_v38  ;;  %v1170_v41 = vmul.f32 1.442695, %v1165_v39  ;;  %v1496_v44 = vsub.f32 %v1480_v22, %v1490_v40  ;;  %v1198_v22 = vmul.f32 %v3928_v7, %v3924_v4 }
 0x676   : > { %v1160_v45 = vpop.xlane.xlu1 %1159  ;;  %v1532_v38 = vpack.c.bf16 %v1528_v34, %v1528_v34  ;;  %v1199_v39 = vmul.f32 %v3931_v8, %v3924_v4  ;;  %v3056_v34 = vld [vmem:[%s3822_s28 + $0x8] sm:$0xff]  }
 0x677   : > { %3079 = vpow2.f32 %v1170_v41  ;;  %v1502_v46 = vmul.f32 1.442695, %v1496_v44  ;;  %v1166_v50 = vsub.f32 %v3944_v27, %v1160_v45  ;;  %v1202_v28 = vpack.c.bf16 %v1198_v22, %v1198_v22 }
 0x678   : > { %v1493_v53 = vpop.xlane.xlu0 %1492  ;;  %v1634_v7 = vsel %vm1211_vm12, %v1532_v38, 0  ;;  %v1203_v44 = vpack.c.bf16 %v1199_v39, %v1199_v39 }
 0x679   : > { %3081 = vpow2.f32 %v1502_v46  ;;  %v1172_v55 = vmul.f32 1.442695, %v1166_v50  ;;  %v1497_v58 = vsub.f32 %v1481_v25, %v1493_v53  ;;  %v1305_v33 = vsel %vm1211_vm12, %v1202_v28, 0 }
 0x67a   : > { %v1163_v59 = vpop.xlane.xlu1 %1162  ;;  %v1351_v4 = vsel %vm1211_vm12, %v1203_v44, 0  ;;  %v1529_v53 = vmul.f32 %v3931_v8, %v3961_v54  ;;  %v3047_v54 = vld [vmem:[%s3820_s19] sm:$0xff]   ;;  %v3058_v44 = vld [vmem:[%s3822_s28 + $0x18] sm:$0xff]  }
 0x67b   : > { %3083 = vpow2.f32 %v1172_v55  ;;  %v1504_v61 = vmul.f32 1.442695, %v1497_v58  ;;  %v1167_v62 = vsub.f32 %v3946_v30, %v1163_v59 }
 0x67c   : > { %v1533_v59 = vpack.c.bf16 %v1529_v53, %v1529_v53  ;;  %v3063_v53 = vld [vmem:[%s3824_s21] sm:$0xff]  }
 0x67d   : > { %v3076_v0 = vpop.eup %3075  ;;  %3085 = vpow2.f32 %v1504_v61  ;;  %v1174_v32 = vmul.f32 1.442695, %v1167_v62 }
 0x67e   : > { %v1506_v56 = vsel %vm1151_vm13, %v3076_v0, 0.0  ;;  %v1680_v8 = vsel %vm1211_vm12, %v1533_v59, 0  ;;  %v3066_v59 = vld [vmem:[%s3824_s21 + $0x18] sm:$0xff]  }
 0x67f   : > { %v3078_v1 = vpop.eup %3077  ;;  %3087 = vpow2.f32 %v1174_v32  ;;  %1507 = vadd.xlane.f32.xlu1 %v1506_v56  ;;  %v3048_v56 = vld [vmem:[%s3820_s19 + $0x8] sm:$0xff]  }
 0x680   : > { %v1509_v27 = vsel %vm1151_vm13, %v3078_v1, 0.0 }
 0x681   : > { %v3080_v2 = vpop.eup %3079 }
 0x682   : > { %v1179_v3 = vsel %vm1151_vm13, %v3080_v2, 0.0 }
 0x683   : > { %v3996_v5 = vpop.eup %3081  ;;  %1510 = vadd.xlane.f32.xlu1 %v1509_v27  ;;  %1180 = vadd.xlane.f32.xlu0 %v1179_v3  ;;  %v3050_v3 = vld [vmem:[%s3820_s19 + $0x18] sm:$0xff]  }
 0x684   : > { %v1512_v30 = vsel %vm1151_vm13, %v3996_v5, 0.0 }
 0x685   : > { %v3084_v6 = vpop.eup %3083 }
 0x686   : > { %v1182_v9 = vsel %vm1151_vm13, %v3084_v6, 0.0 }
 0x687   : > { %v4001_v63 = vpop.eup %3085  ;;  %1513 = vadd.xlane.f32.xlu1 %v1512_v30  ;;  %1183 = vadd.xlane.f32.xlu0 %v1182_v9  ;;  %v3053_v30 = vld [vmem:[%s3820_s19 + $0x30] sm:$0xff]   ;;  %v3054_v9 = vld [vmem:[%s3820_s19 + $0x38] sm:$0xff]  }
 0x688   : > { %v1515_v11 = vsel %vm1151_vm13, %v4001_v63, 0.0 }
 0x689   : > { %v4003_v10 = vpop.eup %3087 }
 0x68a   : > { %v1185_v12 = vsel %vm1151_vm13, %v4003_v10, 0.0 }
 0x68b   : > { %1516 = vadd.xlane.f32.xlu1 %v1515_v11  ;;  %1186 = vadd.xlane.f32.xlu0 %v1185_v12 }
 0x70c   : > { %v1508_v13 = vpop.xlane.xlu1 %1507 }
 0x70d   : > { %3089 = vrcp.f32 %v1508_v13 }
 0x710   : > { %v1181_v14 = vpop.xlane.xlu0 %1180  ;;  %v1511_v15 = vpop.xlane.xlu1 %1510 }
 0x711   : > { %3091 = vrcp.f32 %v1181_v14 }
 0x712   : > { %3093 = vrcp.f32 %v1511_v15 }
 0x714   : > { %v1184_v17 = vpop.xlane.xlu0 %1183  ;;  %v1514_v60 = vpop.xlane.xlu1 %1513 }
 0x715   : > { %3095 = vrcp.f32 %v1184_v17 }
 0x716   : > { %3097 = vrcp.f32 %v1514_v60 }
 0x717   : > { %v3090_v18 = vpop.eup %3089 }
 0x718   : > { %v1522_v20 = vmul.f32 %v3090_v18, %v3076_v0  ;;  %v1187_v36 = vpop.xlane.xlu0 %1186  ;;  %v1517_v45 = vpop.xlane.xlu1 %1516 }
 0x719   : > { %3099 = vrcp.f32 %v1187_v36 }
 0x71a   : > { %v1534_v23 = vpack.c.bf16 %v1522_v20, %v1522_v20  ;;  %3101 = vrcp.f32 %v1517_v45  ;;  %v4073_v20 = vld [vmem:[%s3835_s25] sm:$0xff]  ;;  %v3059_v45 = vld [vmem:[%s3822_s28 + $0x20] sm:$0xff]  }
 0x71b   : > { %v3092_v24 = vpop.eup %3091  ;;  %v1745_v21 = vrot.slane %v4073_v20, %v819_v49 }
 0x71c   : > { %v1193_v25 = vmul.f32 %v3092_v24, %v3080_v2  ;;  %2759 = vmatmul.mubr.msk.bf16.vlgmr.msra.gmra.mrb[16].mxu0 %vm1151_vm13, %v1534_v23  ;;  %v3094_v31 = vpop.eup %3093  ;;  %v3049_v2 = vld [vmem:[%s3820_s19 + $0x10] sm:$0xff]   ;;  %v4081_v24 = vsel %vm1053_vm9, 1.0, %v3438_v19 }
 0x71d   : > { %2763 = vmatpush3.bf16.msra.mxu0 %v1588_v26  ;;  %2764 = vmatprep.mubr.msk.bf16.mxu0 %vm3440_vm1, %v3438_v19  ;;  %v1523_v35 = vmul.f32 %v3094_v31, %v3078_v1 }
 0x71e   : > { %v1205_v29 = vpack.c.bf16 %v1193_v25, %v1193_v25  ;;  %2768 = vmatprep.subr.bf16.mxu0 %v3438_v19 }
 0x71f   : > { %v3096_v37 = vpop.eup %3095  ;;  %v1535_v41 = vpack.c.bf16 %v1523_v35, %v1523_v35 }
 0x720   : > { %2735 = vmatmul.mubr.msk.bf16.vlgmr.msra.gmra.mrb[4].mxu1 %vm1151_vm13, %v1205_v29  ;;  %v1194_v40 = vmul.f32 %v3096_v37, %v3084_v6  ;;  %v3098_v50 = vpop.eup %3097  ;;  %v3052_v6 = vld [vmem:[%s3820_s19 + $0x28] sm:$0xff]  }
 0x721   : > { %2739 = vmatpush3.bf16.msra.mxu1 %v1305_v33  ;;  %2740 = vmatprep.mubr.msk.bf16.mxu1 %vm3440_vm1, %v3438_v19  ;;  %v1524_v55 = vmul.f32 %v3098_v50, %v3996_v5  ;;  %v3051_v5 = vld [vmem:[%s3820_s19 + $0x20] sm:$0xff]   ;;  %v3061_v50 = vld [vmem:[%s3822_s28 + $0x30] sm:$0xff]   ;;  %s4257_s19 = sld [smem:[#allocation19_spill]] }
 0x722   : > { %2744 = vmatprep.subr.bf16.mxu1 %v3438_v19  ;;  %v1206_v46 = vpack.c.bf16 %v1194_v40, %v1194_v40  ;;  %v3055_v33 = vld [vmem:[%s3822_s28] sm:$0xff]  }
 0x723   : > { %v3100_v58 = vpop.eup %3099  ;;  %v1536_v62 = vpack.c.bf16 %v1524_v55, %v1524_v55  ;;  %v3064_v55 = vld [vmem:[%s3824_s21 + $0x8] sm:$0xff]  }
 0x724   : > { %v1195_v61 = vmul.f32 %v3100_v58, %v4003_v10  ;;  %v3102_v32 = vpop.eup %3101  ;;  %v3065_v58 = vld [vmem:[%s3824_s21 + $0x10] sm:$0xff]  }
 0x725   : > { %v1525_v1 = vmul.f32 %v3102_v32, %v4001_v63 }
 0x726   : > { %v1207_v0 = vpack.c.bf16 %v1195_v61, %v1195_v61  ;;  %v3067_v61 = vld [vmem:[%s3824_s21 + $0x20] sm:$0xff]  }
 0x727   : > { %v1537_v27 = vpack.c.bf16 %v1525_v1, %v1525_v1  ;;  %p2583_p10 = scmp.ne.s32.totalorder %s4257_s19, 1 }
 0x728   : > { %2765 = vmatmul.mubr.msk.bf16.vlgmr.msra.gmra.mrb[16].mxu0 %vm1151_vm13, %v1535_v41  ;;  %vm3442_vm14 = vmmov (!%p2583_p10), 0   ;;  %s4258_s12 = sld [smem:[#allocation30_spill]] (!%p2583_p10) }
 0x729   : > { %2769 = vmatpush3.bf16.msra.mxu0 %v1634_v7  ;;  %2770 = vmatprep.mubr.msk.bf16.mxu0 %vm3440_vm1, %v3438_v19  ;;  %v3057_v7 = vld [vmem:[%s3822_s28 + $0x10] sm:$0xff]  }
 0x72a   : > { %2774 = vmatprep.subr.bf16.mxu0 %v3438_v19 }
 0x72c   : > { %2741 = vmatmul.mubr.msk.bf16.vlgmr.msra.gmra.mrb[4].mxu1 %vm1151_vm13, %v1206_v46  ;;  %v3060_v46 = vld [vmem:[%s3822_s28 + $0x28] sm:$0xff]  }
 0x72d   : > { %2745 = vmatpush3.bf16.msra.mxu1 %v1351_v4  ;;  %2746 = vmatprep.mubr.msk.bf16.mxu1 %vm3440_vm1, %v3438_v19  ;;  %v3062_v4 = vld [vmem:[%s3822_s28 + $0x38] sm:$0xff]  }
 0x72e   : > { %2780 = vmatprep.subr.bf16.mxu1 %v3438_v19 }
 0x734   : > { %2771 = vmatmul.mubr.msk.bf16.vlgmr.msra.gmra.mrb[16].mxu0 %vm1151_vm13, %v1536_v62  ;;  %v3068_v62 = vld [vmem:[%s3824_s21 + $0x28] sm:$0xff]  }
 0x735   : > { %2775 = vmatpush3.bf16.msra.mxu0 %v1680_v8  ;;  %2776 = vmatprep.mubr.msk.bf16.mxu0 %vm3440_vm1, %v3438_v19 }
 0x736   : > { %2800 = vmatprep.subr.bf16.mxu0 %v3438_v19 }
 0x738   : > { %2747 = vmatmul.mubr.msk.bf16.vlgmr.msra.gmra.mrb[4].mxu1 %vm1151_vm13, %v1207_v0 }
 0x739   : > { %2781 = vmatpush3.bf16.msra.mxu1 %v3047_v54  ;;  %2796 = vmatprep.mubr.msk.bf16.mxu1 %vm3440_vm1, %v3438_v19 }
 0x73a   : > { %2782 = vmatprep.subr.bf16.mxu1 %v3438_v19 }
 0x73d   : > { %2783 = vmatpush3.bf16.msra.mxu1 %v3048_v56 }
 0x73e   : > { %2784 = vmatprep.subr.bf16.mxu1 %v3438_v19 }
 0x740   : > { %2777 = vmatmul.mubr.msk.bf16.vlgmr.msra.gmra.mrb[16].mxu0 %vm1151_vm13, %v1537_v27 }
 0x741   : > { %2785 = vmatpush3.bf16.msra.mxu1 %v3049_v2  ;;  %2816 = vmatprep.mubr.msk.bf16.mxu0 %vm3440_vm1, %v3438_v19  ;;  %v1867_v2 = vsub.s32 3, %v3889_v47 }
 0x742   : > { %2786 = vmatprep.subr.bf16.mxu1 %v3438_v19  ;;  %2801 = vmatpush3.bf16.msra.mxu0 %v3055_v33 }
 0x743   : > { %2802 = vmatprep.subr.bf16.mxu0 %v3438_v19  ;;  %v1868_v27 = vrot.slane %v4073_v20, %v1867_v2 }
 0x745   : > { %2787 = vmatpush3.bf16.msra.mxu1 %v3050_v3  ;;  %v1873_v3 = vsub.s32 4, %v3889_v47 }
 0x746   : > { %2788 = vmatprep.subr.bf16.mxu1 %v3438_v19  ;;  %2803 = vmatpush3.bf16.msra.mxu0 %v3056_v34 }
 0x747   : > { %2804 = vmatprep.subr.bf16.mxu0 %v3438_v19 }
 0x749   : > { %2789 = vmatpush3.bf16.msra.mxu1 %v3051_v5 }
 0x74a   : > { %2790 = vmatprep.subr.bf16.mxu1 %v3438_v19  ;;  %2805 = vmatpush3.bf16.msra.mxu0 %v3057_v7 }
 0x74b   : > { %2806 = vmatprep.subr.bf16.mxu0 %v3438_v19 }
 0x74d   : > { %2791 = vmatpush3.bf16.msra.mxu1 %v3052_v6 }
 0x74e   : > { %2792 = vmatprep.subr.bf16.mxu1 %v3438_v19  ;;  %2807 = vmatpush3.bf16.msra.mxu0 %v3058_v44 }
 0x74f   : > { %2808 = vmatprep.subr.bf16.mxu0 %v3438_v19 }
 0x751   : > { %2793 = vmatpush3.bf16.msra.mxu1 %v3053_v30 }
 0x752   : > { %2794 = vmatprep.subr.bf16.mxu1 %v3438_v19  ;;  %2809 = vmatpush3.bf16.msra.mxu0 %v3059_v45 }
 0x753   : > { %2810 = vmatprep.subr.bf16.mxu0 %v3438_v19 }
 0x755   : > { %2795 = vmatpush3.bf16.msra.mxu1 %v3054_v9 }
 0x756   : > { %2820 = vmatprep.subr.bf16.mxu1 %v3438_v19  ;;  %2811 = vmatpush3.bf16.msra.mxu0 %v3060_v46 }
 0x757   : > { %2812 = vmatprep.subr.bf16.mxu0 %v3438_v19 }
 0x75a   : > { %2813 = vmatpush3.bf16.msra.mxu0 %v3061_v50 }
 0x75b   : > { %2814 = vmatprep.subr.bf16.mxu0 %v3438_v19 }
 0x75e   : > { %2815 = vmatpush3.bf16.msra.mxu0 %v3062_v4 }
 0x80b   : > { %v1387_v63 = vpop.f32.mrb[4].mxu1 }
 0x80c   : > { %v2860_v10 = vadd.f32 %v1387_v63, %v3975_v57  ;;  %v2748_v11 = vpop.f32.mrb[5].mxu1 }
 0x80d   : > { %v1390_v12 = vpop.f32.mrb[6].mxu1 }
 0x80e   : > { %v2749_v13 = vpop.f32.mrb[7].mxu1 }
 0x813   : > { %v1716_v14 = vpop.f32.mrb[16].mxu0 }
 0x814   : > { %v1725_v15 = vpack.c.bf16 %v1716_v14, %v2860_v10  ;;  %v2778_v16 = vpop.f32.mrb[17].mxu0  ;;  %v1874_v10 = vrot.slane %v4073_v20, %v1873_v3  ;;  %v3111_v3 = vld [vmem:[#allocation12] sm:$0xff] (!%p2583_p10)  }
 0x815   : > { %v1719_v17 = vpop.f32.mrb[18].mxu0  ;;  %v3070_v16 = vld [vmem:[%s3824_s21 + $0x38] sm:$0xff]  }
 0x816   : > { %v2779_v18 = vpop.f32.mrb[19].mxu0  ;;  %2797 = vmatmul.mubr.bf16.vlgmr.msra.gmra.mrb[8].mxu1 %v1725_v15  ;;  %v3069_v15 = vld [vmem:[%s3824_s21 + $0x30] sm:$0xff]   ;;  %v1897_v17 = vrot.slane %v4073_v20, %v823_v51 }
 0x817   : > { %2836 = vmatprep.mubr.msk.bf16.mxu1 %vm3440_vm1, %v3438_v19  ;;  %2821 = vmatpush3.bf16.msra.mxu1 %v3063_v53 }
 0x818   : > { %2822 = vmatprep.subr.bf16.mxu1 %v3438_v19 }
 0x81b   : > { %2823 = vmatpush3.bf16.msra.mxu1 %v3064_v55 }
 0x81c   : > { %2824 = vmatprep.subr.bf16.mxu1 %v3438_v19 }
 0x81f   : > { %2825 = vmatpush3.bf16.msra.mxu1 %v3065_v58 }
 0x820   : > { %2826 = vmatprep.subr.bf16.mxu1 %v3438_v19 }
 0x823   : > { %2827 = vmatpush3.bf16.msra.mxu1 %v3066_v59  ;;  %v2129_v59 = vsub.s32 5, %v3889_v47 }
 0x824   : > { %2828 = vmatprep.subr.bf16.mxu1 %v3438_v19 }
 0x827   : > { %2829 = vmatpush3.bf16.msra.mxu1 %v3067_v61  ;;  %v2135_v61 = vsub.s32 6, %v3889_v47  ;;  %v3112_v47 = vld [vmem:[#allocation12 + $0x8] sm:$0xff] (!%p2583_p10)  }
 0x828   : > { %2830 = vmatprep.subr.bf16.mxu1 %v3438_v19 }
 0x82b   : > { %2831 = vmatpush3.bf16.msra.mxu1 %v3068_v62  ;;  %v2130_v62 = vrot.slane %v4073_v20, %v2129_v59 }
 0x82c   : > { %2832 = vmatprep.subr.bf16.mxu1 %v3438_v19 }
 0x82f   : > { %2833 = vmatpush3.bf16.msra.mxu1 %v3069_v15 }
 0x830   : > { %2834 = vmatprep.subr.bf16.mxu1 %v3438_v19  ;;  %v2009_v19 = vrot.slane %v4073_v20, %v827_v52 }
 0x833   : > { %2835 = vmatpush3.bf16.msra.mxu1 %v3070_v16 }
 0x8e9   : > { %v1828_v57 = vpop.f32.mrb[8].mxu1 }
 0x8ea   : > { %v1829_v22 = vadd.f32 %v1828_v57, %v1745_v21  ;;  %v2798_v23 = vpop.f32.mrb[9].mxu1 }
 0x8eb   : > { %v1831_v25 = vpop.f32.mrb[10].mxu1 }
 0x8ec   : > { %v1837_v26 = vadd.f32 %v1829_v22, %v3877_v42  ;;  %v1832_v28 = vadd.f32 %v1831_v25, %v1745_v21  ;;  %v2799_v60 = vpop.f32.mrb[11].mxu1 }
 0x8ee   : > { %v1838_v29 = vadd.f32 %v1832_v28, %v3879_v43  ;;  %v1839_v31 = vmul.f32 %v4081_v24, %v1837_v26 }
 0x8f0   : > { %1841 = vadd.xlane.f32.xlu0 %v1839_v31  ;;  %v1840_v49 = vmul.f32 %v4081_v24, %v1838_v29 }
 0x8f2   : > { %1843 = vadd.xlane.f32.xlu1 %v1840_v49 }
 0x97d   : > { %v1842_v42 = vpop.xlane.xlu0 %1841 }
 0x97e   : > { %v1845_v48 = vmul.f32 0.03125, %v1842_v42 }
 0x97f   : > { %v1844_v35 = vpop.xlane.xlu1 %1843 }
 0x980   : > { %v1847_v43 = vsub.f32 %v1837_v26, %v1845_v48  ;;  %v1846_v36 = vmul.f32 0.03125, %v1844_v35 }
 0x982   : > { %v1848_v37 = vsub.f32 %v1838_v29, %v1846_v36  ;;  %v1849_v38 = vmul.f32 %v4081_v24, %v1847_v43 }
 0x984   : > { %v1851_v39 = vmul.f32 %v1849_v38, %v1849_v38  ;;  %v1850_v40 = vmul.f32 %v4081_v24, %v1848_v37 }
 0x986   : > { %1853 = vadd.xlane.f32.xlu0 %v1851_v39  ;;  %v1852_v41 = vmul.f32 %v1850_v40, %v1850_v40 }
 0x988   : > { %1855 = vadd.xlane.f32.xlu1 %v1852_v41 }
 0xa13   : > { %v1854_v8 = vpop.xlane.xlu0 %1853 }
 0xa14   : > { %v1857_v54 = vmul.f32 0.03125, %v1854_v8 }
 0xa15   : > { %v1856_v0 = vpop.xlane.xlu1 %1855 }
 0xa16   : > { %v1859_v32 = vadd.f32 1e-05, %v1857_v54  ;;  %v1858_v56 = vmul.f32 0.03125, %v1856_v0 }
 0xa18   : > { %3103 = vrsqrt.f32 %v1859_v32  ;;  %v1860_v1 = vadd.f32 1e-05, %v1858_v56 }
 0xa1a   : > { %3105 = vrsqrt.f32 %v1860_v1 }
 0xa22   : > { %v3104_v5 = vpop.eup %3103 }
 0xa23   : > { %v1863_v6 = vmul.f32 %v3104_v5, %v1849_v38  ;;  %v3441_v5 = vmov (!%p2583_p10), 0.0  }
 0xa24   : > { %v3106_v30 = vpop.eup %3105  ;;  %2840 = vmatprep.subr.bf16.mxu0 (!%p2583_p10), %v3441_v5 }
 0xa25   : > { %v1864_v9 = vmul.f32 %v3106_v30, %v1850_v40  ;;  %v1869_v63 = vmul.f32 %v1868_v27, %v1863_v6  ;;  %v3114_v6 = vld [vmem:[#allocation12 + $0x18] sm:$0xff] (!%p2583_p10)   ;;  %v3115_v30 = vld [vmem:[#allocation12 + $0x20] sm:$0xff] (!%p2583_p10)  }
 0xa27   : > { %v1870_v11 = vmul.f32 %v1868_v27, %v1864_v9  ;;  %v1875_v12 = vadd.f32 %v1874_v10, %v1869_v63  ;;  %v3116_v9 = vld [vmem:[#allocation12 + $0x28] sm:$0xff] (!%p2583_p10)   ;;  %v3117_v63 = vld [vmem:[#allocation12 + $0x30] sm:$0xff] (!%p2583_p10)  }
 0xa29   : > { %v1876_v13 = vadd.f32 %v1874_v10, %v1870_v11  ;;  %v3118_v10 = vld [vmem:[#allocation12 + $0x38] sm:$0xff] (!%p2583_p10)  }
 0xa2b   : > { %v1877_v14 = vpack.c.bf16 %v1876_v13, %v1875_v12 }
 0xa2d   : > { %2817 = vmatmul.mubr.bf16.vlgmr.msra.gmra.mrb[20].mxu0 %v1877_v14 }
 0xa2e   : > { %2841 = vmatpush3.bf16.msra.mxu0 (!%p2583_p10), %v3111_v3  ;;  %2856 = vmatprep.mubr.msk.bf16.mxu0 (!%p2583_p10), %vm3442_vm14, %v3441_v5 }
 0xa2f   : > { %2842 = vmatprep.subr.bf16.mxu0 (!%p2583_p10), %v3441_v5 }
 0xa32   : > { %2843 = vmatpush3.bf16.msra.mxu0 (!%p2583_p10), %v3112_v47 }
 0xa33   : > { %2844 = vmatprep.subr.bf16.mxu0 (!%p2583_p10), %v3441_v5 }
 0xb00   : > { %v1980_v18 = vpop.f32.mrb[20].mxu0 }
 0xb01   : > { %v1981_v21 = vadd.f32 %v1980_v18, %v1897_v17  ;;  %v2818_v57 = vpop.f32.mrb[21].mxu0 }
 0xb02   : > { %v1983_v22 = vpop.f32.mrb[22].mxu0 }
 0xb03   : > { %v1984_v23 = vadd.f32 %v1983_v22, %v1897_v17  ;;  %v2819_v25 = vpop.f32.mrb[23].mxu0  ;;  %v1987_v26 = vmax.f32 %v1981_v21, 0.0 }
 0xb05   : > { %v1988_v28 = vmax.f32 %v1984_v23, 0.0 }
 0xb07   : > { %v1989_v60 = vpack.c.bf16 %v1988_v28, %v1987_v26 }
 0xb09   : > { %2837 = vmatmul.mubr.bf16.vlgmr.msra.gmra.mrb[12].mxu1 %v1989_v60 }
 0xbdc   : > { %v2092_v29 = vpop.f32.mrb[12].mxu1 }
 0xbdd   : > { %v2093_v31 = vadd.f32 %v2092_v29, %v2009_v19  ;;  %v2838_v49 = vpop.f32.mrb[13].mxu1 }
 0xbde   : > { %v2095_v33 = vpop.f32.mrb[14].mxu1 }
 0xbdf   : > { %v2099_v34 = vadd.f32 %v2093_v31, %v1875_v12  ;;  %v2096_v51 = vadd.f32 %v2095_v33, %v2009_v19  ;;  %v2839_v42 = vpop.f32.mrb[15].mxu1  ;;  %v2584_v12 = vld [vmem:[%s4258_s12] ss:$0 sm:$0xff] (!%p2583_p10) }
 0xbe1   : > { %v2100_v48 = vadd.f32 %v2096_v51, %v1876_v13  ;;  %v2101_v35 = vmul.f32 %v4081_v24, %v2099_v34 }
 0xbe3   : > { %2103 = vadd.xlane.f32.xlu0 %v2101_v35  ;;  %v2102_v43 = vmul.f32 %v4081_v24, %v2100_v48 }
 0xbe5   : > { %2105 = vadd.xlane.f32.xlu1 %v2102_v43 }
 0xc70   : > { %v2104_v36 = vpop.xlane.xlu0 %2103 }
 0xc71   : > { %v2107_v37 = vmul.f32 0.03125, %v2104_v36 }
 0xc72   : > { %v2106_v38 = vpop.xlane.xlu1 %2105 }
 0xc73   : > { %v2109_v39 = vsub.f32 %v2099_v34, %v2107_v37  ;;  %v2108_v40 = vmul.f32 0.03125, %v2106_v38 }
 0xc75   : > { %v2110_v52 = vsub.f32 %v2100_v48, %v2108_v40  ;;  %v2111_v41 = vmul.f32 %v4081_v24, %v2109_v39 }
 0xc77   : > { %v2113_v7 = vmul.f32 %v2111_v41, %v2111_v41  ;;  %v2112_v44 = vmul.f32 %v4081_v24, %v2110_v52  ;;  %v2136_v24 = vrot.slane %v4073_v20, %v2135_v61  ;;  %v3113_v20 = vld [vmem:[#allocation12 + $0x10] sm:$0xff] (!%p2583_p10)  }
 0xc78   : > { %2845 = vmatpush3.bf16.msra.mxu0 (!%p2583_p10), %v3113_v20 }
 0xc79   : > { %2115 = vadd.xlane.f32.xlu0 %v2113_v7  ;;  %v2114_v45 = vmul.f32 %v2112_v44, %v2112_v44  ;;  %2846 = vmatprep.subr.bf16.mxu0 (!%p2583_p10), %v3441_v5 }
 0xc7b   : > { %2117 = vadd.xlane.f32.xlu1 %v2114_v45 }
 0xc7c   : > { %2847 = vmatpush3.bf16.msra.mxu0 (!%p2583_p10), %v3114_v6 }
 0xc7d   : > { %2848 = vmatprep.subr.bf16.mxu0 (!%p2583_p10), %v3441_v5 }
 0xc80   : > { %2849 = vmatpush3.bf16.msra.mxu0 (!%p2583_p10), %v3115_v30 }
 0xc81   : > { %2850 = vmatprep.subr.bf16.mxu0 (!%p2583_p10), %v3441_v5 }
 0xc84   : > { %2851 = vmatpush3.bf16.msra.mxu0 (!%p2583_p10), %v3116_v9 }
 0xc85   : > { %2852 = vmatprep.subr.bf16.mxu0 (!%p2583_p10), %v3441_v5 }
 0xc88   : > { %2853 = vmatpush3.bf16.msra.mxu0 (!%p2583_p10), %v3117_v63 }
 0xc89   : > { %2854 = vmatprep.subr.bf16.mxu0 (!%p2583_p10), %v3441_v5 }
 0xc8c   : > { %2855 = vmatpush3.bf16.msra.mxu0 (!%p2583_p10), %v3118_v10 }
 0xd06   : > { %v2116_v46 = vpop.xlane.xlu0 %2115 }
 0xd07   : > { %v2119_v50 = vmul.f32 0.03125, %v2116_v46 }
 0xd08   : > { %v2118_v4 = vpop.xlane.xlu1 %2117 }
 0xd09   : > { %v2121_v53 = vadd.f32 1e-05, %v2119_v50  ;;  %v2120_v55 = vmul.f32 0.03125, %v2118_v4 }
 0xd0b   : > { %3107 = vrsqrt.f32 %v2121_v53  ;;  %v2122_v58 = vadd.f32 1e-05, %v2120_v55 }
 0xd0d   : > { %3109 = vrsqrt.f32 %v2122_v58 }
 0xd15   : > { %v3108_v8 = vpop.eup %3107 }
 0xd16   : > { %v2125_v54 = vmul.f32 %v3108_v8, %v2111_v41 }
 0xd17   : > { %v3110_v0 = vpop.eup %3109 }
 0xd18   : > { %v2131_v32 = vmul.f32 %v2130_v62, %v2125_v54  ;;  %v2126_v56 = vmul.f32 %v3110_v0, %v2112_v44  ;;  %2144 = sbr.rel (%p2583_p10) target bundleno = 3893 (0xf35), region = 104 }
 0xd1a   : > { %v2137_v1 = vadd.f32 %v2136_v24, %v2131_v32  ;;  %v2132_v2 = vmul.f32 %v2130_v62, %v2126_v56 }
 0xd1c   : > { %2139 = vst [vmem:[#allocation2] sm:$0xff] %v2137_v1  ;;  %v2138_v27 = vadd.f32 %v2136_v24, %v2132_v2 }
 0xd1e   : > { %2140 = vst [vmem:[#allocation2 + $0x8] sm:$0xff] %v2138_v27  ;;  %v2145_v11 = vpack.c.bf16 (!%p2583_p10), %v2138_v27, %v2137_v1 }
 0xd20   : > { %2857 = vmatmul.mubr.bf16.vlgmr.msra.gmra.mrb[0].mxu0 %v2145_v11 }
 0xdf3   : > { %v2251_v13 = vpop.f32.mrb[0].mxu0 }
 0xdf4   : > { %v2252_v14 = vadd.f32 %v2584_v12, %v2251_v13  ;;  %v2858_v15 = vpop.f32.mrb[1].mxu0 }
 0xdf5   : > { %v2254_v16 = vpop.f32.mrb[2].mxu0 }
 0xdf6   : > { %2258 = vmax.xlane.f32.xlu0 %v2252_v14  ;;  %v2859_v17 = vpop.f32.mrb[3].mxu0  ;;  %v2255_v18 = vadd.f32 %v2584_v12, %v2254_v16 }
 0xdfa   : > { %2260 = vmax.xlane.f32.xlu0 %v2255_v18 }
 0xe83   : > { %v2259_v21 = vpop.xlane.xlu0 %2258 }
 0xe84   : > { %v2262_v57 = vsub.f32 %v2252_v14, %v2259_v21 }
 0xe86   : > { %v2264_v22 = vmul.f32 1.442695, %v2262_v57 }
 0xe87   : > { %v2261_v23 = vpop.xlane.xlu0 %2260 }
 0xe88   : > { %v2263_v25 = vsub.f32 %v2255_v18, %v2261_v23  ;;  %3119 = vpow2.f32 %v2264_v22 }
 0xe8a   : > { %v2266_v26 = vmul.f32 1.442695, %v2263_v25 }
 0xe8c   : > { %3121 = vpow2.f32 %v2266_v26 }
 0xe92   : > { %v3120_v28 = vpop.eup %3119 }
 0xe93   : > { %2268 = vadd.xlane.f32.xlu1 %v3120_v28 }
 0xe96   : > { %v3122_v60 = vpop.eup %3121 }
 0xe97   : > { %2270 = vadd.xlane.f32.xlu1 %v3122_v60 }
 0xf20   : > { %v2269_v19 = vpop.xlane.xlu1 %2268 }
 0xf21   : > { %3123 = vlog2.f32 %v2269_v19 }
 0xf24   : > { %v2271_v29 = vpop.xlane.xlu1 %2270 }
 0xf25   : > { %3125 = vlog2.f32 %v2271_v29 }
 0xf2b   : > { %v3124_v31 = vpop.eup %3123 }
 0xf2c   : > { %v2273_v49 = vmul.f32 0.6931472, %v3124_v31 }
 0xf2e   : > { %v2276_v33 = vsub.f32 %v2262_v57, %v2273_v49 }
 0xf2f   : > { %v3126_v34 = vpop.eup %3125 }
 0xf30   : > { %2278 = vst [vmem:[#allocation13] sm:$0xff] %v2276_v33  ;;  %v2275_v51 = vmul.f32 0.6931472, %v3126_v34 }
 0xf32   : > { %v2277_v42 = vsub.f32 %v2263_v25, %v2275_v51 }
 0xf34   : > { %2279 = vst [vmem:[#allocation13 + $0x8] sm:$0xff] %v2277_v42 }
 0xf35 PF: > { %p2939_p6 = scmp.eq.s32.totalorder %s3540_s27, 1  ;;  %s3443_s15 = smov [#allocation13]  }
 0xf36   : > { %s2289_s9 = sshll.u32 %s3443_s15, 4  ;;  %s2290_s9 = int_to_ptr.vmem [resolvable:$true] %s2289_s9 }
 0xf37   : > { %s3331_s29 = scalar_lea.vmem %s2290_s9, 256  ;;  %p3338_p11 = scmp.lt.s32.totalorder %s2290_s9, %s2290_s9 }
 0xf38   : > { %p3332_p5 = scmp.ne.s32.totalorder %s2290_s9, %s3331_s29  ;;  %p3339_p0 = scmp.lt.s32.totalorder %s3331_s29, %s3331_s29 }
 0xf3a   : > { %p3333_p4 = pnand %p3332_p5, %p2939_p6  ;;  %p3340_p7 = por %p3339_p0, %p3338_p11 }
 0xf3c   : > { %p3334_p13 = pneg %p3333_p4 }
 0xf3e   : > { %p3341_p9 = pnand %p3340_p7, %p3334_p13 }
 0xf40   : > { %3344 = shalt.err (!%p3341_p9)
}
 0xf41   : > { %s4259_s24 = sld [smem:[#allocation31_spill]] }
 0xf47   : > { %s4260_s13 = smov %s4259_s24  ;;  %s3345_s25 = scalar_lea.hbm %s4259_s24, 256 }
 0xf48   : > { %p3346_p12 = scmp.ne.s32.totalorder %s4260_s13, %s3345_s25  ;;  %p3351_p1 = scmp.lt.u32.totalorder %s3345_s25, %s4260_s13 }
 0xf4a   : > { %p3347_p3 = pnand %p3346_p12, %p2939_p6 }
 0xf4c   : > { %p3348_p8 = pneg %p3347_p3 }
 0xf4e   : > { %p3353_p2 = pnand %p3351_p1, %p3348_p8 }
 0xf50   : > { %3356 = shalt.err (!%p3353_p2)
}
 0xf51   : > { %s3444_s20 = smov 128   ;;  %s3445_s16 = smov 8  }
 0xf52   : > { %2906 = dma.vmem_to_hbm [thread:$0]  (%p2939_p6), %s2290_s9, 256, %s4260_s13, [#allocation5], %s3444_s20, %s3444_s20, %s3445_s16  }
 0xf53   : > { %3398 = dma.done.wait (%p2939_p6), [#allocation5], 256  }
 0xf54   : > { %3400 = vsyncadd (%p2939_p6), [#allocation5], 4294967040 }
 0xf55 PF: > { %s25_s26 = sadd.s32 1, %s3423_s26   ;;  %s4261_s4 = sld [smem:[#allocation22_spill]] }
 0xf56   : > { %p22_p10 = scmp.ge.s32.totalorder %s25_s26, 4   ;;  %s4262_s24 = sld [smem:[#allocation20_spill]] }
 0xf57   : > { %s4263_s25 = sld [smem:[#allocation21_spill]]  ;;  %s4264_s21 = smov %s3407_s22 }
 0xf58   : > { %s4265_s22 = smov %s3411_s23  ;;  %24 = sbr.rel (!%p22_p10) target bundleno = 15 (0xf), region = 169 }
 0xf5b   : > { %s4266_s23 = smov %s4261_s4 }
 0xf5f   :  { %2305 = vsyncpa [#allocation4], 1 }
 0xf60   :  { %2307 = vsyncpa [#allocation4 + $0x1], 1 }
 0xf61   :  { %2308 = vsyncpa [#allocation7], 1 }
 0xf62   :  { %2309 = vsyncpa [#allocation5], 1 }
 0xf63   :  { %2311 = vsyncpa [#allocation5 + $0x1], 1 }

</bundles_post_ra>
